<compile_context>
chip_gen: v5e
topology: v5e:2x2
jax: 0.10.0
libtpu: 0.0.40
codegen_flags: <defaults>
</compile_context>

<pallas_src>
import functools

import jax
import jax.numpy as jnp
from jax import lax
from jax.experimental import pallas as pl
from jax.experimental.pallas import tpu as pltpu


def _round_up(n, m):
    return (n + m - 1) // m * m


def _choose_conv_tile(m, cp_in, cp_out, cap=512, budget=12 * 1024 * 1024):
    """Largest multiple-of-8 M tile dividing m whose double-buffered footprint
    stays under ~12 MiB (safe inside v5e's 16 MiB default scoped VMEM); else the
    full dim (single block)."""
    fixed = (2 * (3 * cp_in) * cp_out * 2      # packed conv weight, double-buffered
             + 2 * 8 * (2 * cp_in) * 2         # 8-row halo block, double-buffered
             + cp_out * 4)                     # bias
    cand = min(cap, (m // 8) * 8)
    while cand >= 8:
        if m % cand == 0:
            per_tile = 2 * cand * (2 * cp_in) * 2 + 2 * cand * cp_out * 2
            if fixed + per_tile <= budget:
                return cand
        cand -= 8
    return m


def _choose_m_tile(m):
    for cand in (256, 128, 64, 32, 16, 8):     # 256 fills the v6e/v7x MXU rows
        if m % cand == 0:
            return cand
    return m  # small M: full-dim block (allowed when block dim == array dim)


def _choose_n_tile(n):
    # Prefer >= 2 N tiles so the second v7x TensorCore gets independent (i, j)
    # work even at tiny batch (harmless on single-TC v5e/v6e).
    for cand in (1024, 512, 256, 128):
        if cand <= n // 2 and n % cand == 0:
            return cand
    return n


def _choose_k_tile(k, tn, budget=4 * 1024 * 1024):
    # Keep the double-buffered bf16 weight block under ~4 MiB.
    for cand in (2048, 1024, 512, 256, 128):
        if k % cand == 0 and cand * tn * 2 * 2 <= budget:
            return cand
    return k


# ----------------------------------------------------------------------------
# Pallas kernels
# ----------------------------------------------------------------------------
def _conv_kernel(*refs, has_halo, l2):
    """Stride-2 / k=3 / pad=1 Conv1d + bias + ReLU on one (TM, 2*Cp) block of the
    batch-folded even/odd view (B*L2, 2*Cp):  row g = [x[2l], x[2l+1]] of batch
    g // L2, l = g % L2.

      out[g] = x[2l-1] @ W0 + x[2l] @ W1 + x[2l+1] @ W2
             = [prev_odd | row_g] @ [W0; W1; W2]          (single MXU contraction)

    prev_odd for the tile's first row comes from a minimal 8-row halo block (the
    block containing global row i*TM-1); batch boundaries (g % L2 == 0, i.e. the
    conv's left zero-padding) are masked to zero.
    """
    if has_halo:
        x_ref, halo_ref, w_ref, b_ref, o_ref = refs
    else:
        x_ref, w_ref, b_ref, o_ref = refs
        halo_ref = None

    tm, cp2 = x_ref.shape
    cp = cp2 // 2
    xc = x_ref[...]                       # (TM, 2Cp) bf16 = [x[2l] | x[2l+1]]
    odd = xc[:, cp:]                      # (TM, Cp)       = x[2l+1]

    if halo_ref is not None:
        first = halo_ref[7:8, cp:]        # (1, Cp) odd half of global row i*TM-1
    else:
        first = jnp.zeros((1, cp), xc.dtype)
    if tm > 1:
        prev = jnp.concatenate([first, odd[:tm - 1, :]], axis=0)   # (TM, Cp)
    else:
        prev = first

    row = lax.broadcasted_iota(jnp.int32, (tm, 1), 0)
    g = pl.program_id(0) * tm + row                     # global output row index
    prev = jnp.where(g % l2 == 0, jnp.zeros_like(prev), prev)      # left padding

    lhs = jnp.concatenate([prev, xc], axis=1)           # (TM, 3Cp)
    acc = jnp.dot(lhs, w_ref[...], preferred_element_type=jnp.float32)
    o_ref[...] = jnp.maximum(acc + b_ref[...], 0.0).astype(o_ref.dtype)


def _fc_kernel(x_ref, w_ref, b_ref, o_ref, *, apply_relu):
    """K-tiled matmul accumulating directly into the resident f32 output block;
    bias (+ ReLU) epilogue in place on the last K step."""
    k = pl.program_id(2)

    @pl.when(k == 0)
    def _init():
        o_ref[...] = jnp.zeros_like(o_ref)

    o_ref[...] += jnp.dot(x_ref[...], w_ref[...],
                          preferred_element_type=jnp.float32)

    @pl.when(k == pl.num_programs(2) - 1)
    def _finalize():
        y = o_ref[...] + b_ref[...]
        if apply_relu:
            y = jnp.maximum(y, 0.0)
        o_ref[...] = y


def _log_softmax_kernel(x_ref, o_ref):
    """LogSoftmax over the S (axis=1) dimension of the whole (B, S, Fp) block."""
    x = x_ref[...]                                      # (B, S, Fp) f32
    m = jnp.max(x, axis=1, keepdims=True)
    z = x - m
    lse = jnp.log(jnp.sum(jnp.exp(z), axis=1, keepdims=True))
    o_ref[...] = z - lse


# ----------------------------------------------------------------------------
# Pallas wrappers
# ----------------------------------------------------------------------------
def conv_block(x, p):
    """x: (B, L, Cp_in) bf16 -> (B, ceil(L/2), Cp_out) bf16 (conv + bias + ReLU)."""
    B, L, cp_in = x.shape
    w_all, bias = p["w"], p["bias"]
    assert w_all.shape[0] == 3 * cp_in
    cp_out = w_all.shape[1]

    if L % 2:  # trailing zero row == Conv1d right padding; keeps L_out = int((L+1)/2)
        x = jnp.pad(x, ((0, 0), (0, 1), (0, 0)))
        L += 1
    L2 = L // 2
    M = B * L2
    x2 = x.reshape(M, 2 * cp_in)          # batch-folded even/odd view (free reshape)

    TM = _choose_conv_tile(M, cp_in, cp_out)
    n_mt = M // TM
    has_halo = n_mt > 1                   # minimal 8-row halo only when M is tiled
    nb8 = TM // 8 if has_halo else 1

    in_specs = [pl.BlockSpec((TM, 2 * cp_in), lambda i: (i, 0))]
    operands = [x2]
    if has_halo:
        # 8-row block containing the previous tile's last row (clamped at i==0;
        # the garbage value there is masked in-kernel since g % L2 == 0).
        in_specs.append(pl.BlockSpec(
            (8, 2 * cp_in), lambda i: (jnp.maximum(i * nb8 - 1, 0), 0)))
        operands.append(x2)
    in_specs += [
        pl.BlockSpec((3 * cp_in, cp_out), lambda i: (0, 0)),
        pl.BlockSpec((1, cp_out), lambda i: (0, 0)),
    ]
    operands += [w_all, bias]

    out = pl.pallas_call(
        functools.partial(_conv_kernel, has_halo=has_halo, l2=L2),
        grid=(n_mt,),
        in_specs=in_specs,
        out_specs=pl.BlockSpec((TM, cp_out), lambda i: (i, 0)),
        out_shape=jax.ShapeDtypeStruct((M, cp_out), jnp.bfloat16),
        compiler_params=pltpu.CompilerParams(dimension_semantics=("parallel",)),
    )(*operands)
    return out.reshape(B, L2, cp_out)


def fc_matmul(x, w, bias, apply_relu=False):
    """x:(M,K) bf16 @ w:(K,N) bf16 + bias, (M,N)-parallel / K-tiled, f32 output
    block used directly as the accumulator."""
    M, K = x.shape
    Kw, Np = w.shape
    assert K == Kw and K % 128 == 0 and Np % 128 == 0
    TM = _choose_m_tile(M)
    TN = _choose_n_tile(Np)
    TK = _choose_k_tile(K, TN)
    grid = (M // TM, Np // TN, K // TK)

    return pl.pallas_call(
        functools.partial(_fc_kernel, apply_relu=apply_relu),
        grid=grid,
        in_specs=[
            pl.BlockSpec((TM, TK), lambda i, j, k: (i, k)),
            pl.BlockSpec((TK, TN), lambda i, j, k: (k, j)),
            pl.BlockSpec((1, TN), lambda i, j, k: (0, j)),
        ],
        out_specs=pl.BlockSpec((TM, TN), lambda i, j, k: (i, j)),
        out_shape=jax.ShapeDtypeStruct((M, Np), jnp.float32),
        compiler_params=pltpu.CompilerParams(
            dimension_semantics=("parallel", "parallel", "arbitrary")),
    )(x, w, bias)


def log_softmax_dim1(x):
    """x: (B, S, Fp) f32 -> LogSoftmax over axis 1, single grid step (S*Fp tiny)."""
    B, S, Fp = x.shape
    return pl.pallas_call(
        _log_softmax_kernel,
        grid=(1,),
        in_specs=[pl.BlockSpec((B, S, Fp), lambda i: (0, 0, 0))],
        out_specs=pl.BlockSpec((B, S, Fp), lambda i: (0, 0, 0)),
        out_shape=jax.ShapeDtypeStruct((B, S, Fp), jnp.float32),
    )(x)


# ----------------------------------------------------------------------------
# Network forward (glue in plain JAX, hot path in Pallas)
# ----------------------------------------------------------------------------
@functools.partial(jax.jit, static_argnames=("seq_length_out", "n_feature_out"))
def convnet_forward(x, params, *, seq_length_out, n_feature_out):
    assert seq_length_out > 1  # TODO(synk): seq_length_out == 1 path not implemented
    B, L, c_in = x.shape
    cp_in0 = params["blocks"][0]["w"].shape[0] // 3
    # pad channels to 128 lanes ONCE and cast to bf16; layout kept end-to-end
    x = jnp.pad(x, ((0, 0), (0, 0), (0, cp_in0 - c_in))).astype(jnp.bfloat16)

    for blk in params["blocks"]:
        x = conv_block(x, blk)

    B, l_final, cp_last = x.shape
    x = x.reshape(B, l_final * cp_last)   # flatten; torch (C,L) order folded into fc weight

    fc = params["fc"]
    logits = fc_matmul(x, fc["w"], fc["bias"])              # (B, S * Fp) f32
    fp = fc["bias"].shape[1] // seq_length_out
    logits = logits.reshape(B, seq_length_out, fp)          # free reshape
    logp = log_softmax_dim1(logits)
    return logp[:, :, :n_feature_out]


# ----------------------------------------------------------------------------
# Deterministic parameter init (synthetic, torch-layout weights then repacked)
# ----------------------------------------------------------------------------
def _pack_conv_block(w, b):
    """w: (c_out, c_in, 3) torch layout, b: (c_out,) -> single packed tap matrix
    [W0; W1; W2] of shape (3*Cp_in, Cp_out) bf16 and a (1, Cp_out) f32 bias."""
    c_out, c_in, _ = w.shape
    cp_in = _round_up(c_in, 128)
    cp_out = _round_up(c_out, 128)
    w_all = jnp.zeros((3 * cp_in, cp_out), jnp.float32)
    for t in range(3):
        w_all = w_all.at[t * cp_in:t * cp_in + c_in, :c_out].set(w[:, :, t].T)
    bias = jnp.zeros((1, cp_out), jnp.float32).at[0, :c_out].set(b)
    return {"w": w_all.astype(jnp.bfloat16), "bias": bias}


def _pack_fc(w_fc, b_fc, c_last, l_final, s_out, f_out):
    """Permute torch Linear rows from (C,L)-flatten order to this layout's (L,Cp)
    order and spread output columns to a lane-dense (S, Fp=128-multiple) grid."""
    cp_last = _round_up(c_last, 128)
    fp = _round_up(f_out, 128)
    w_r = w_fc.reshape(s_out, f_out, c_last, l_final)    # [s, f, c, l]
    w_r = jnp.transpose(w_r, (3, 2, 0, 1))               # [l, c, s, f]
    w = jnp.zeros((l_final, cp_last, s_out, fp), jnp.float32)
    w = w.at[:, :c_last, :, :f_out].set(w_r)
    w = w.reshape(l_final * cp_last, s_out * fp)
    bias = jnp.zeros((s_out, fp), jnp.float32).at[:, :f_out].set(
        b_fc.reshape(s_out, f_out))
    bias = bias.reshape(1, s_out * fp)
    return {"w": w.astype(jnp.bfloat16), "bias": bias}


def init_convnet(key, *, n_feature_in, n_feature_out, seq_length, seq_length_out,
                 hidden_dim, n_layer, kernel_size=3):
    assert kernel_size == 3  # TODO(synk): general kernel_size not implemented
    input_dims = [n_feature_in] + [hidden_dim * min(2 ** i, 8) for i in range(n_layer - 1)]
    output_dims = [hidden_dim * min(2 ** i, 8) for i in range(n_layer)]

    keys = jax.random.split(key, n_layer + 1)
    blocks_pallas, blocks_ref = [], []
    for li, (c_in, c_out) in enumerate(zip(input_dims, output_dims)):
        kw, kb = jax.random.split(keys[li])
        w = jax.random.normal(kw, (c_out, c_in, 3), jnp.float32) / jnp.sqrt(c_in * 3)
        b = 0.05 * jax.random.normal(kb, (c_out,), jnp.float32)
        blocks_ref.append({"w": w, "b": b})
        blocks_pallas.append(_pack_conv_block(w, b))

    tmp = seq_length
    for _ in range(n_layer):
        tmp = int((tmp + 1) / 2)
    l_final = tmp
    c_last = output_dims[-1]
    in_features = c_last * l_final
    out_features = seq_length_out * n_feature_out
    kw, kb = jax.random.split(keys[n_layer])
    w_fc = jax.random.normal(kw, (out_features, in_features), jnp.float32) / jnp.sqrt(in_features)
    b_fc = 0.05 * jax.random.normal(kb, (out_features,), jnp.float32)

    params = {"blocks": blocks_pallas,
              "fc": _pack_fc(w_fc, b_fc, c_last, l_final, seq_length_out, n_feature_out)}
    ref = {"blocks": blocks_ref, "fc": {"w": w_fc, "b": b_fc}}
    return params, ref


# ----------------------------------------------------------------------------
# Plain-XLA reference of the same module (for in-script correctness checking)
# ----------------------------------------------------------------------------
def reference_forward(x, ref_params, *, seq_length_out, n_feature_out):
    h = x
    for blk in ref_params["blocks"]:
        out = lax.conv_general_dilated(
            h.astype(jnp.bfloat16), blk["w"].astype(jnp.bfloat16),
            window_strides=(2,), padding=[(1, 1)],
            dimension_numbers=("NWC", "OIW", "NWC"),
            preferred_element_type=jnp.float32)
        h = jnp.maximum(out + blk["b"][None, None, :], 0.0)
    hb = h.astype(jnp.bfloat16)
    B = hb.shape[0]
    flat = jnp.transpose(hb, (0, 2, 1)).reshape(B, -1)       # torch (B, C, L) flatten
    fc = ref_params["fc"]
    logits = jnp.dot(flat, fc["w"].T.astype(jnp.bfloat16),
                     preferred_element_type=jnp.float32) + fc["b"][None, :]
    logits = logits.reshape(B, seq_length_out, n_feature_out)
    return jax.nn.log_softmax(logits, axis=1)


def _run_config(name, *, B, n_feature_in, n_feature_out, seq_length,
                seq_length_out, hidden_dim, n_layer, key):
    kp, kx = jax.random.split(key)
    params, ref_params = init_convnet(
        kp, n_feature_in=n_feature_in, n_feature_out=n_feature_out,
        seq_length=seq_length, seq_length_out=seq_length_out,
        hidden_dim=hidden_dim, n_layer=n_layer)
    x = jax.random.normal(kx, (B, seq_length, n_feature_in), jnp.float32)

    y = convnet_forward(x, params, seq_length_out=seq_length_out,
                        n_feature_out=n_feature_out)
    y = jax.block_until_ready(y)

    assert y.shape == (B, seq_length_out, n_feature_out), (name, y.shape)
    assert bool(jnp.all(jnp.isfinite(y))), name
    # log-probabilities must normalise over dim=1
    assert bool(jnp.allclose(jnp.exp(y).sum(axis=1), 1.0, atol=1e-3)), name
    # cross-check against the plain-XLA reference of the same module (bf16 MXU path)
    y_ref = reference_forward(x, ref_params, seq_length_out=seq_length_out,
                              n_feature_out=n_feature_out)
    err = float(jnp.max(jnp.abs(y - y_ref)))
    assert bool(jnp.allclose(y, y_ref, atol=5e-2, rtol=5e-2)), (name, err)


if __name__ == "__main__":
    key = jax.random.PRNGKey(0)
    k1, k2 = jax.random.split(key)

    # SMALL configuration consistent with the module (single-tile conv layers,
    # single-K-step FC).
    _run_config("small", B=2, n_feature_in=8, n_feature_out=3, seq_length=64,
                seq_length_out=4, hidden_dim=16, n_layer=4, key=k1)

    # Slightly larger configuration to exercise the tiled-M conv path (8-row
    # halo block) and the K-tiled / N-tiled FC accumulation path.
    _run_config("tiled", B=4, n_feature_in=8, n_feature_out=3, seq_length=512,
                seq_length_out=4, hidden_dim=16, n_layer=3, key=k2)

    print("KERNEL_OK")
</pallas_src>

<mosaic_0001>
module attributes {stable_mosaic.version = 11 : i64} {
  func.func @_conv_kernel(%arg0: i32, %arg1: memref<16x256xbf16, #tpu.memory_space<vmem>>, %arg2: memref<384x128xbf16, #tpu.memory_space<vmem>>, %arg3: memref<1x128xf32, #tpu.memory_space<vmem>>, %arg4: memref<16x128xbf16, #tpu.memory_space<vmem>>) attributes {dimension_semantics = [#tpu.dimension_semantics<parallel>], iteration_bounds = array<i64: 1>, scalar_prefetch = 0 : i64, scratch_operands = 0 : i64, tpu.core_type = #tpu.core_type<tc>, window_params = [{transform_indices = @transform_0, window_bounds = array<i64: 16, 256>}, {pipeline_mode = #tpu.pipeline_mode<synchronous>, transform_indices = @transform_1, window_bounds = array<i64: 384, 128>}, {pipeline_mode = #tpu.pipeline_mode<synchronous>, transform_indices = @transform_2, window_bounds = array<i64: 1, 128>}, {transform_indices = @transform_3, window_bounds = array<i64: 16, 128>}]} {
    %c0 = arith.constant 0 : index
    %c0_0 = arith.constant 0 : index
    %0 = vector.load %arg1[%c0, %c0_0] : memref<16x256xbf16, #tpu.memory_space<vmem>>, vector<16x256xbf16>
    %1 = vector.extract_strided_slice %0 {offsets = [0, 128], sizes = [16, 128], strides = [1, 1]} : vector<16x256xbf16> to vector<16x128xbf16>
    %cst = arith.constant 0.000000e+00 : bf16
    %2 = vector.broadcast %cst : bf16 to vector<1x128xbf16>
    %3 = vector.extract_strided_slice %1 {offsets = [0, 0], sizes = [15, 128], strides = [1, 1]} : vector<16x128xbf16> to vector<15x128xbf16>
    %4 = tpu.concatenate %2, %3 in 0 : vector<1x128xbf16>, vector<15x128xbf16> -> vector<16x128xbf16>
    %5 = tpu.iota {dimensions = array<i32: 0>} : vector<16x1xi32>
    %c16_i32 = arith.constant 16 : i32
    %6 = arith.muli %arg0, %c16_i32 : i32
    %7 = vector.broadcast %6 : i32 to vector<16x1xi32>
    %8 = arith.addi %7, %5 : vector<16x1xi32>
    %c8_i32 = arith.constant 8 : i32
    %c0_i32 = arith.constant 0 : i32
    %9 = arith.cmpi eq, %c8_i32, %c0_i32 : i32
    %c1_i32 = arith.constant 1 : i32
    %10 = arith.select %9, %c1_i32, %c8_i32 : i32
    %11 = vector.broadcast %10 : i32 to vector<16x1xi32>
    %12 = arith.remsi %8, %11 : vector<16x1xi32>
    %c0_i32_1 = arith.constant 0 : i32
    %13 = vector.broadcast %c0_i32_1 : i32 to vector<16x1xi32>
    %14 = arith.cmpi ne, %12, %13 : vector<16x1xi32>
    %c0_i32_2 = arith.constant 0 : i32
    %15 = vector.broadcast %c0_i32_2 : i32 to vector<16x1xi32>
    %16 = arith.cmpi slt, %12, %15 : vector<16x1xi32>
    %c0_i32_3 = arith.constant 0 : i32
    %17 = arith.cmpi slt, %10, %c0_i32_3 : i32
    %18 = vector.broadcast %17 : i1 to vector<16x1xi1>
    %19 = vector.broadcast %18 : vector<16x1xi1> to vector<16x1xi1>
    %20 = arith.xori %16, %19 : vector<16x1xi1>
    %21 = arith.andi %20, %14 : vector<16x1xi1>
    %22 = vector.broadcast %10 : i32 to vector<16x1xi32>
    %23 = arith.addi %12, %22 : vector<16x1xi32>
    %24 = arith.select %21, %23, %12 : vector<16x1xi1>, vector<16x1xi32>
    %c0_i32_4 = arith.constant 0 : i32
    %25 = vector.broadcast %c0_i32_4 : i32 to vector<16x1xi32>
    %26 = arith.cmpi eq, %24, %25 : vector<16x1xi32>
    %cst_5 = arith.constant 0.000000e+00 : bf16
    %27 = vector.broadcast %cst_5 : bf16 to vector<16x128xbf16>
    %28 = vector.shape_cast %26 : vector<16x1xi1> to vector<16x1xi1>
    %29 = vector.broadcast %28 : vector<16x1xi1> to vector<16x128xi1>
    %30 = arith.select %29, %27, %4 : vector<16x128xi1>, vector<16x128xbf16>
    %31 = tpu.concatenate %30, %0 in 1 : vector<16x128xbf16>, vector<16x256xbf16> -> vector<16x384xbf16>
    %c0_6 = arith.constant 0 : index
    %c0_7 = arith.constant 0 : index
    %32 = vector.load %arg2[%c0_6, %c0_7] : memref<384x128xbf16, #tpu.memory_space<vmem>>, vector<384x128xbf16>
    %cst_8 = arith.constant dense<0.000000e+00> : vector<16x128xf32>
    %33 = tpu.matmul %31, %32, %cst_8 {dimension_numbers = #tpu.dot_dimension_numbers<[1], [0], [0], [1], [0, 0, 1, 1], [], []>} : vector<16x384xbf16>, vector<384x128xbf16>, vector<16x128xf32> -> vector<16x128xf32>
    %c0_9 = arith.constant 0 : index
    %c0_10 = arith.constant 0 : index
    %34 = vector.load %arg3[%c0_9, %c0_10] : memref<1x128xf32, #tpu.memory_space<vmem>>, vector<1x128xf32>
    %35 = vector.broadcast %34 : vector<1x128xf32> to vector<16x128xf32>
    %36 = arith.addf %33, %35 : vector<16x128xf32>
    %cst_11 = arith.constant 0.000000e+00 : f32
    %37 = vector.broadcast %cst_11 : f32 to vector<16x128xf32>
    %38 = arith.maximumf %36, %37 : vector<16x128xf32>
    %39 = arith.truncf %38 : vector<16x128xf32> to vector<16x128xbf16>
    %c0_12 = arith.constant 0 : index
    %c0_13 = arith.constant 0 : index
    %40 = vector.load %arg4[%c0_12, %c0_13] : memref<16x128xbf16, #tpu.memory_space<vmem>>, vector<16x128xbf16>
    tpu.vector_store %arg4[%c0_12, %c0_13], %39 {strides = array<i32>} : memref<16x128xbf16, #tpu.memory_space<vmem>>, vector<16x128xbf16>,
    return
  }
  func.func @transform_0(%arg0: i32) -> (i32, i32) {
    %c0_i32 = arith.constant 0 : i32
    %c0_i32_0 = arith.constant 0 : i32
    return %arg0, %c0_i32 : i32, i32
  }
  func.func @transform_1(%arg0: i32) -> (i32, i32) {
    %c0_i32 = arith.constant 0 : i32
    %c0_i32_0 = arith.constant 0 : i32
    %c0_i32_1 = arith.constant 0 : i32
    return %c0_i32, %c0_i32_0 : i32, i32
  }
  func.func @transform_2(%arg0: i32) -> (i32, i32) {
    %c0_i32 = arith.constant 0 : i32
    %c0_i32_0 = arith.constant 0 : i32
    %c0_i32_1 = arith.constant 0 : i32
    return %c0_i32, %c0_i32_0 : i32, i32
  }
  func.func @transform_3(%arg0: i32) -> (i32, i32) {
    %c0_i32 = arith.constant 0 : i32
    %c0_i32_0 = arith.constant 0 : i32
    return %arg0, %c0_i32 : i32, i32
  }
}

module attributes {stable_mosaic.version = 11 : i64} {
  func.func @_conv_kernel(%arg0: i32, %arg1: memref<64x256xbf16, #tpu.memory_space<vmem>>, %arg2: memref<384x128xbf16, #tpu.memory_space<vmem>>, %arg3: memref<1x128xf32, #tpu.memory_space<vmem>>, %arg4: memref<64x128xbf16, #tpu.memory_space<vmem>>) attributes {dimension_semantics = [#tpu.dimension_semantics<parallel>], iteration_bounds = array<i64: 1>, scalar_prefetch = 0 : i64, scratch_operands = 0 : i64, tpu.core_type = #tpu.core_type<tc>, window_params = [{transform_indices = @transform_0, window_bounds = array<i64: 64, 256>}, {pipeline_mode = #tpu.pipeline_mode<synchronous>, transform_indices = @transform_1, window_bounds = array<i64: 384, 128>}, {pipeline_mode = #tpu.pipeline_mode<synchronous>, transform_indices = @transform_2, window_bounds = array<i64: 1, 128>}, {transform_indices = @transform_3, window_bounds = array<i64: 64, 128>}]} {
    %c0 = arith.constant 0 : index
    %c0_0 = arith.constant 0 : index
    %0 = vector.load %arg1[%c0, %c0_0] : memref<64x256xbf16, #tpu.memory_space<vmem>>, vector<64x256xbf16>
    %1 = vector.extract_strided_slice %0 {offsets = [0, 128], sizes = [64, 128], strides = [1, 1]} : vector<64x256xbf16> to vector<64x128xbf16>
    %cst = arith.constant 0.000000e+00 : bf16
    %2 = vector.broadcast %cst : bf16 to vector<1x128xbf16>
    %3 = vector.extract_strided_slice %1 {offsets = [0, 0], sizes = [63, 128], strides = [1, 1]} : vector<64x128xbf16> to vector<63x128xbf16>
    %4 = tpu.concatenate %2, %3 in 0 : vector<1x128xbf16>, vector<63x128xbf16> -> vector<64x128xbf16>
    %5 = tpu.iota {dimensions = array<i32: 0>} : vector<64x1xi32>
    %c64_i32 = arith.constant 64 : i32
    %6 = arith.muli %arg0, %c64_i32 : i32
    %7 = vector.broadcast %6 : i32 to vector<64x1xi32>
    %8 = arith.addi %7, %5 : vector<64x1xi32>
    %c32_i32 = arith.constant 32 : i32
    %c0_i32 = arith.constant 0 : i32
    %9 = arith.cmpi eq, %c32_i32, %c0_i32 : i32
    %c1_i32 = arith.constant 1 : i32
    %10 = arith.select %9, %c1_i32, %c32_i32 : i32
    %11 = vector.broadcast %10 : i32 to vector<64x1xi32>
    %12 = arith.remsi %8, %11 : vector<64x1xi32>
    %c0_i32_1 = arith.constant 0 : i32
    %13 = vector.broadcast %c0_i32_1 : i32 to vector<64x1xi32>
    %14 = arith.cmpi ne, %12, %13 : vector<64x1xi32>
    %c0_i32_2 = arith.constant 0 : i32
    %15 = vector.broadcast %c0_i32_2 : i32 to vector<64x1xi32>
    %16 = arith.cmpi slt, %12, %15 : vector<64x1xi32>
    %c0_i32_3 = arith.constant 0 : i32
    %17 = arith.cmpi slt, %10, %c0_i32_3 : i32
    %18 = vector.broadcast %17 : i1 to vector<64x1xi1>
    %19 = vector.broadcast %18 : vector<64x1xi1> to vector<64x1xi1>
    %20 = arith.xori %16, %19 : vector<64x1xi1>
    %21 = arith.andi %20, %14 : vector<64x1xi1>
    %22 = vector.broadcast %10 : i32 to vector<64x1xi32>
    %23 = arith.addi %12, %22 : vector<64x1xi32>
    %24 = arith.select %21, %23, %12 : vector<64x1xi1>, vector<64x1xi32>
    %c0_i32_4 = arith.constant 0 : i32
    %25 = vector.broadcast %c0_i32_4 : i32 to vector<64x1xi32>
    %26 = arith.cmpi eq, %24, %25 : vector<64x1xi32>
    %cst_5 = arith.constant 0.000000e+00 : bf16
    %27 = vector.broadcast %cst_5 : bf16 to vector<64x128xbf16>
    %28 = vector.shape_cast %26 : vector<64x1xi1> to vector<64x1xi1>
    %29 = vector.broadcast %28 : vector<64x1xi1> to vector<64x128xi1>
    %30 = arith.select %29, %27, %4 : vector<64x128xi1>, vector<64x128xbf16>
    %31 = tpu.concatenate %30, %0 in 1 : vector<64x128xbf16>, vector<64x256xbf16> -> vector<64x384xbf16>
    %c0_6 = arith.constant 0 : index
    %c0_7 = arith.constant 0 : index
    %32 = vector.load %arg2[%c0_6, %c0_7] : memref<384x128xbf16, #tpu.memory_space<vmem>>, vector<384x128xbf16>
    %cst_8 = arith.constant dense<0.000000e+00> : vector<64x128xf32>
    %33 = tpu.matmul %31, %32, %cst_8 {dimension_numbers = #tpu.dot_dimension_numbers<[1], [0], [0], [1], [0, 0, 1, 1], [], []>} : vector<64x384xbf16>, vector<384x128xbf16>, vector<64x128xf32> -> vector<64x128xf32>
    %c0_9 = arith.constant 0 : index
    %c0_10 = arith.constant 0 : index
    %34 = vector.load %arg3[%c0_9, %c0_10] : memref<1x128xf32, #tpu.memory_space<vmem>>, vector<1x128xf32>
    %35 = vector.broadcast %34 : vector<1x128xf32> to vector<64x128xf32>
    %36 = arith.addf %33, %35 : vector<64x128xf32>
    %cst_11 = arith.constant 0.000000e+00 : f32
    %37 = vector.broadcast %cst_11 : f32 to vector<64x128xf32>
    %38 = arith.maximumf %36, %37 : vector<64x128xf32>
    %39 = arith.truncf %38 : vector<64x128xf32> to vector<64x128xbf16>
    %c0_12 = arith.constant 0 : index
    %c0_13 = arith.constant 0 : index
    %40 = vector.load %arg4[%c0_12, %c0_13] : memref<64x128xbf16, #tpu.memory_space<vmem>>, vector<64x128xbf16>
    tpu.vector_store %arg4[%c0_12, %c0_13], %39 {strides = array<i32>} : memref<64x128xbf16, #tpu.memory_space<vmem>>, vector<64x128xbf16>,
    return
  }
  func.func @transform_0(%arg0: i32) -> (i32, i32) {
    %c0_i32 = arith.constant 0 : i32
    %c0_i32_0 = arith.constant 0 : i32
    return %arg0, %c0_i32 : i32, i32
  }
  func.func @transform_1(%arg0: i32) -> (i32, i32) {
    %c0_i32 = arith.constant 0 : i32
    %c0_i32_0 = arith.constant 0 : i32
    %c0_i32_1 = arith.constant 0 : i32
    return %c0_i32, %c0_i32_0 : i32, i32
  }
  func.func @transform_2(%arg0: i32) -> (i32, i32) {
    %c0_i32 = arith.constant 0 : i32
    %c0_i32_0 = arith.constant 0 : i32
    %c0_i32_1 = arith.constant 0 : i32
    return %c0_i32, %c0_i32_0 : i32, i32
  }
  func.func @transform_3(%arg0: i32) -> (i32, i32) {
    %c0_i32 = arith.constant 0 : i32
    %c0_i32_0 = arith.constant 0 : i32
    return %arg0, %c0_i32 : i32, i32
  }
}

module attributes {stable_mosaic.version = 11 : i64} {
  func.func @_conv_kernel(%arg0: i32, %arg1: memref<32x256xbf16, #tpu.memory_space<vmem>>, %arg2: memref<384x128xbf16, #tpu.memory_space<vmem>>, %arg3: memref<1x128xf32, #tpu.memory_space<vmem>>, %arg4: memref<32x128xbf16, #tpu.memory_space<vmem>>) attributes {dimension_semantics = [#tpu.dimension_semantics<parallel>], iteration_bounds = array<i64: 1>, scalar_prefetch = 0 : i64, scratch_operands = 0 : i64, tpu.core_type = #tpu.core_type<tc>, window_params = [{transform_indices = @transform_0, window_bounds = array<i64: 32, 256>}, {pipeline_mode = #tpu.pipeline_mode<synchronous>, transform_indices = @transform_1, window_bounds = array<i64: 384, 128>}, {pipeline_mode = #tpu.pipeline_mode<synchronous>, transform_indices = @transform_2, window_bounds = array<i64: 1, 128>}, {transform_indices = @transform_3, window_bounds = array<i64: 32, 128>}]} {
    %c0 = arith.constant 0 : index
    %c0_0 = arith.constant 0 : index
    %0 = vector.load %arg1[%c0, %c0_0] : memref<32x256xbf16, #tpu.memory_space<vmem>>, vector<32x256xbf16>
    %1 = vector.extract_strided_slice %0 {offsets = [0, 128], sizes = [32, 128], strides = [1, 1]} : vector<32x256xbf16> to vector<32x128xbf16>
    %cst = arith.constant 0.000000e+00 : bf16
    %2 = vector.broadcast %cst : bf16 to vector<1x128xbf16>
    %3 = vector.extract_strided_slice %1 {offsets = [0, 0], sizes = [31, 128], strides = [1, 1]} : vector<32x128xbf16> to vector<31x128xbf16>
    %4 = tpu.concatenate %2, %3 in 0 : vector<1x128xbf16>, vector<31x128xbf16> -> vector<32x128xbf16>
    %5 = tpu.iota {dimensions = array<i32: 0>} : vector<32x1xi32>
    %c32_i32 = arith.constant 32 : i32
    %6 = arith.muli %arg0, %c32_i32 : i32
    %7 = vector.broadcast %6 : i32 to vector<32x1xi32>
    %8 = arith.addi %7, %5 : vector<32x1xi32>
    %c16_i32 = arith.constant 16 : i32
    %c0_i32 = arith.constant 0 : i32
    %9 = arith.cmpi eq, %c16_i32, %c0_i32 : i32
    %c1_i32 = arith.constant 1 : i32
    %10 = arith.select %9, %c1_i32, %c16_i32 : i32
    %11 = vector.broadcast %10 : i32 to vector<32x1xi32>
    %12 = arith.remsi %8, %11 : vector<32x1xi32>
    %c0_i32_1 = arith.constant 0 : i32
    %13 = vector.broadcast %c0_i32_1 : i32 to vector<32x1xi32>
    %14 = arith.cmpi ne, %12, %13 : vector<32x1xi32>
    %c0_i32_2 = arith.constant 0 : i32
    %15 = vector.broadcast %c0_i32_2 : i32 to vector<32x1xi32>
    %16 = arith.cmpi slt, %12, %15 : vector<32x1xi32>
    %c0_i32_3 = arith.constant 0 : i32
    %17 = arith.cmpi slt, %10, %c0_i32_3 : i32
    %18 = vector.broadcast %17 : i1 to vector<32x1xi1>
    %19 = vector.broadcast %18 : vector<32x1xi1> to vector<32x1xi1>
    %20 = arith.xori %16, %19 : vector<32x1xi1>
    %21 = arith.andi %20, %14 : vector<32x1xi1>
    %22 = vector.broadcast %10 : i32 to vector<32x1xi32>
    %23 = arith.addi %12, %22 : vector<32x1xi32>
    %24 = arith.select %21, %23, %12 : vector<32x1xi1>, vector<32x1xi32>
    %c0_i32_4 = arith.constant 0 : i32
    %25 = vector.broadcast %c0_i32_4 : i32 to vector<32x1xi32>
    %26 = arith.cmpi eq, %24, %25 : vector<32x1xi32>
    %cst_5 = arith.constant 0.000000e+00 : bf16
    %27 = vector.broadcast %cst_5 : bf16 to vector<32x128xbf16>
    %28 = vector.shape_cast %26 : vector<32x1xi1> to vector<32x1xi1>
    %29 = vector.broadcast %28 : vector<32x1xi1> to vector<32x128xi1>
    %30 = arith.select %29, %27, %4 : vector<32x128xi1>, vector<32x128xbf16>
    %31 = tpu.concatenate %30, %0 in 1 : vector<32x128xbf16>, vector<32x256xbf16> -> vector<32x384xbf16>
    %c0_6 = arith.constant 0 : index
    %c0_7 = arith.constant 0 : index
    %32 = vector.load %arg2[%c0_6, %c0_7] : memref<384x128xbf16, #tpu.memory_space<vmem>>, vector<384x128xbf16>
    %cst_8 = arith.constant dense<0.000000e+00> : vector<32x128xf32>
    %33 = tpu.matmul %31, %32, %cst_8 {dimension_numbers = #tpu.dot_dimension_numbers<[1], [0], [0], [1], [0, 0, 1, 1], [], []>} : vector<32x384xbf16>, vector<384x128xbf16>, vector<32x128xf32> -> vector<32x128xf32>
    %c0_9 = arith.constant 0 : index
    %c0_10 = arith.constant 0 : index
    %34 = vector.load %arg3[%c0_9, %c0_10] : memref<1x128xf32, #tpu.memory_space<vmem>>, vector<1x128xf32>
    %35 = vector.broadcast %34 : vector<1x128xf32> to vector<32x128xf32>
    %36 = arith.addf %33, %35 : vector<32x128xf32>
    %cst_11 = arith.constant 0.000000e+00 : f32
    %37 = vector.broadcast %cst_11 : f32 to vector<32x128xf32>
    %38 = arith.maximumf %36, %37 : vector<32x128xf32>
    %39 = arith.truncf %38 : vector<32x128xf32> to vector<32x128xbf16>
    %c0_12 = arith.constant 0 : index
    %c0_13 = arith.constant 0 : index
    %40 = vector.load %arg4[%c0_12, %c0_13] : memref<32x128xbf16, #tpu.memory_space<vmem>>, vector<32x128xbf16>
    tpu.vector_store %arg4[%c0_12, %c0_13], %39 {strides = array<i32>} : memref<32x128xbf16, #tpu.memory_space<vmem>>, vector<32x128xbf16>,
    return
  }
  func.func @transform_0(%arg0: i32) -> (i32, i32) {
    %c0_i32 = arith.constant 0 : i32
    %c0_i32_0 = arith.constant 0 : i32
    return %arg0, %c0_i32 : i32, i32
  }
  func.func @transform_1(%arg0: i32) -> (i32, i32) {
    %c0_i32 = arith.constant 0 : i32
    %c0_i32_0 = arith.constant 0 : i32
    %c0_i32_1 = arith.constant 0 : i32
    return %c0_i32, %c0_i32_0 : i32, i32
  }
  func.func @transform_2(%arg0: i32) -> (i32, i32) {
    %c0_i32 = arith.constant 0 : i32
    %c0_i32_0 = arith.constant 0 : i32
    %c0_i32_1 = arith.constant 0 : i32
    return %c0_i32, %c0_i32_0 : i32, i32
  }
  func.func @transform_3(%arg0: i32) -> (i32, i32) {
    %c0_i32 = arith.constant 0 : i32
    %c0_i32_0 = arith.constant 0 : i32
    return %arg0, %c0_i32 : i32, i32
  }
}

module attributes {stable_mosaic.version = 11 : i64} {
  func.func @_conv_kernel(%arg0: i32, %arg1: memref<8x256xbf16, #tpu.memory_space<vmem>>, %arg2: memref<384x128xbf16, #tpu.memory_space<vmem>>, %arg3: memref<1x128xf32, #tpu.memory_space<vmem>>, %arg4: memref<8x128xbf16, #tpu.memory_space<vmem>>) attributes {dimension_semantics = [#tpu.dimension_semantics<parallel>], iteration_bounds = array<i64: 1>, scalar_prefetch = 0 : i64, scratch_operands = 0 : i64, tpu.core_type = #tpu.core_type<tc>, window_params = [{transform_indices = @transform_0, window_bounds = array<i64: 8, 256>}, {pipeline_mode = #tpu.pipeline_mode<synchronous>, transform_indices = @transform_1, window_bounds = array<i64: 384, 128>}, {pipeline_mode = #tpu.pipeline_mode<synchronous>, transform_indices = @transform_2, window_bounds = array<i64: 1, 128>}, {transform_indices = @transform_3, window_bounds = array<i64: 8, 128>}]} {
    %c0 = arith.constant 0 : index
    %c0_0 = arith.constant 0 : index
    %0 = vector.load %arg1[%c0, %c0_0] : memref<8x256xbf16, #tpu.memory_space<vmem>>, vector<8x256xbf16>
    %1 = vector.extract_strided_slice %0 {offsets = [0, 128], sizes = [8, 128], strides = [1, 1]} : vector<8x256xbf16> to vector<8x128xbf16>
    %cst = arith.constant 0.000000e+00 : bf16
    %2 = vector.broadcast %cst : bf16 to vector<1x128xbf16>
    %3 = vector.extract_strided_slice %1 {offsets = [0, 0], sizes = [7, 128], strides = [1, 1]} : vector<8x128xbf16> to vector<7x128xbf16>
    %4 = tpu.concatenate %2, %3 in 0 : vector<1x128xbf16>, vector<7x128xbf16> -> vector<8x128xbf16>
    %5 = tpu.iota {dimensions = array<i32: 0>} : vector<8x1xi32>
    %c8_i32 = arith.constant 8 : i32
    %6 = arith.muli %arg0, %c8_i32 : i32
    %7 = vector.broadcast %6 : i32 to vector<8x1xi32>
    %8 = arith.addi %7, %5 : vector<8x1xi32>
    %c4_i32 = arith.constant 4 : i32
    %c0_i32 = arith.constant 0 : i32
    %9 = arith.cmpi eq, %c4_i32, %c0_i32 : i32
    %c1_i32 = arith.constant 1 : i32
    %10 = arith.select %9, %c1_i32, %c4_i32 : i32
    %11 = vector.broadcast %10 : i32 to vector<8x1xi32>
    %12 = arith.remsi %8, %11 : vector<8x1xi32>
    %c0_i32_1 = arith.constant 0 : i32
    %13 = vector.broadcast %c0_i32_1 : i32 to vector<8x1xi32>
    %14 = arith.cmpi ne, %12, %13 : vector<8x1xi32>
    %c0_i32_2 = arith.constant 0 : i32
    %15 = vector.broadcast %c0_i32_2 : i32 to vector<8x1xi32>
    %16 = arith.cmpi slt, %12, %15 : vector<8x1xi32>
    %c0_i32_3 = arith.constant 0 : i32
    %17 = arith.cmpi slt, %10, %c0_i32_3 : i32
    %18 = vector.broadcast %17 : i1 to vector<8x1xi1>
    %19 = vector.broadcast %18 : vector<8x1xi1> to vector<8x1xi1>
    %20 = arith.xori %16, %19 : vector<8x1xi1>
    %21 = arith.andi %20, %14 : vector<8x1xi1>
    %22 = vector.broadcast %10 : i32 to vector<8x1xi32>
    %23 = arith.addi %12, %22 : vector<8x1xi32>
    %24 = arith.select %21, %23, %12 : vector<8x1xi1>, vector<8x1xi32>
    %c0_i32_4 = arith.constant 0 : i32
    %25 = vector.broadcast %c0_i32_4 : i32 to vector<8x1xi32>
    %26 = arith.cmpi eq, %24, %25 : vector<8x1xi32>
    %cst_5 = arith.constant 0.000000e+00 : bf16
    %27 = vector.broadcast %cst_5 : bf16 to vector<8x128xbf16>
    %28 = vector.shape_cast %26 : vector<8x1xi1> to vector<8x1xi1>
    %29 = vector.broadcast %28 : vector<8x1xi1> to vector<8x128xi1>
    %30 = arith.select %29, %27, %4 : vector<8x128xi1>, vector<8x128xbf16>
    %31 = tpu.concatenate %30, %0 in 1 : vector<8x128xbf16>, vector<8x256xbf16> -> vector<8x384xbf16>
    %c0_6 = arith.constant 0 : index
    %c0_7 = arith.constant 0 : index
    %32 = vector.load %arg2[%c0_6, %c0_7] : memref<384x128xbf16, #tpu.memory_space<vmem>>, vector<384x128xbf16>
    %cst_8 = arith.constant dense<0.000000e+00> : vector<8x128xf32>
    %33 = tpu.matmul %31, %32, %cst_8 {dimension_numbers = #tpu.dot_dimension_numbers<[1], [0], [0], [1], [0, 0, 1, 1], [], []>} : vector<8x384xbf16>, vector<384x128xbf16>, vector<8x128xf32> -> vector<8x128xf32>
    %c0_9 = arith.constant 0 : index
    %c0_10 = arith.constant 0 : index
    %34 = vector.load %arg3[%c0_9, %c0_10] : memref<1x128xf32, #tpu.memory_space<vmem>>, vector<1x128xf32>
    %35 = vector.broadcast %34 : vector<1x128xf32> to vector<8x128xf32>
    %36 = arith.addf %33, %35 : vector<8x128xf32>
    %cst_11 = arith.constant 0.000000e+00 : f32
    %37 = vector.broadcast %cst_11 : f32 to vector<8x128xf32>
    %38 = arith.maximumf %36, %37 : vector<8x128xf32>
    %39 = arith.truncf %38 : vector<8x128xf32> to vector<8x128xbf16>
    %c0_12 = arith.constant 0 : index
    %c0_13 = arith.constant 0 : index
    %40 = vector.load %arg4[%c0_12, %c0_13] : memref<8x128xbf16, #tpu.memory_space<vmem>>, vector<8x128xbf16>
    tpu.vector_store %arg4[%c0_12, %c0_13], %39 {strides = array<i32>} : memref<8x128xbf16, #tpu.memory_space<vmem>>, vector<8x128xbf16>,
    return
  }
  func.func @transform_0(%arg0: i32) -> (i32, i32) {
    %c0_i32 = arith.constant 0 : i32
    %c0_i32_0 = arith.constant 0 : i32
    return %arg0, %c0_i32 : i32, i32
  }
  func.func @transform_1(%arg0: i32) -> (i32, i32) {
    %c0_i32 = arith.constant 0 : i32
    %c0_i32_0 = arith.constant 0 : i32
    %c0_i32_1 = arith.constant 0 : i32
    return %c0_i32, %c0_i32_0 : i32, i32
  }
  func.func @transform_2(%arg0: i32) -> (i32, i32) {
    %c0_i32 = arith.constant 0 : i32
    %c0_i32_0 = arith.constant 0 : i32
    %c0_i32_1 = arith.constant 0 : i32
    return %c0_i32, %c0_i32_0 : i32, i32
  }
  func.func @transform_3(%arg0: i32) -> (i32, i32) {
    %c0_i32 = arith.constant 0 : i32
    %c0_i32_0 = arith.constant 0 : i32
    return %arg0, %c0_i32 : i32, i32
  }
}

module attributes {stable_mosaic.version = 11 : i64} {
  func.func @_fc_kernel(%arg0: i32, %arg1: i32, %arg2: i32, %arg3: memref<2x512xbf16, #tpu.memory_space<vmem>>, %arg4: memref<512x256xbf16, #tpu.memory_space<vmem>>, %arg5: memref<1x256xf32, #tpu.memory_space<vmem>>, %arg6: memref<2x256xf32, #tpu.memory_space<vmem>>) attributes {dimension_semantics = [#tpu.dimension_semantics<parallel>, #tpu.dimension_semantics<parallel>, #tpu.dimension_semantics<arbitrary>], iteration_bounds = array<i64: 1, 2, 1>, scalar_prefetch = 0 : i64, scratch_operands = 0 : i64, tpu.core_type = #tpu.core_type<tc>, window_params = [{transform_indices = @transform_0, window_bounds = array<i64: 2, 512>}, {transform_indices = @transform_1, window_bounds = array<i64: 512, 256>}, {transform_indices = @transform_2, window_bounds = array<i64: 1, 256>}, {transform_indices = @transform_3, window_bounds = array<i64: 2, 256>}]} {
    %c0_i32 = arith.constant 0 : i32
    %0 = arith.cmpi eq, %arg2, %c0_i32 : i32
    %1 = arith.extui %0 : i1 to i32
    %c0_i32_0 = arith.constant 0 : i32
    %2 = arith.cmpi ne, %1, %c0_i32_0 : i32
    scf.if %2 {
      %cst_10 = arith.constant 0.000000e+00 : f32
      %12 = vector.broadcast %cst_10 : f32 to vector<2x256xf32>
      %c0_11 = arith.constant 0 : index
      %c0_12 = arith.constant 0 : index
      %13 = vector.load %arg6[%c0_11, %c0_12] : memref<2x256xf32, #tpu.memory_space<vmem>>, vector<2x256xf32>
      tpu.vector_store %arg6[%c0_11, %c0_12], %12 {strides = array<i32>} : memref<2x256xf32, #tpu.memory_space<vmem>>, vector<2x256xf32>,
    } else {
    }
    %c0 = arith.constant 0 : index
    %c0_1 = arith.constant 0 : index
    %3 = vector.load %arg6[%c0, %c0_1] : memref<2x256xf32, #tpu.memory_space<vmem>>, vector<2x256xf32>
    %c0_2 = arith.constant 0 : index
    %c0_3 = arith.constant 0 : index
    %4 = vector.load %arg3[%c0_2, %c0_3] : memref<2x512xbf16, #tpu.memory_space<vmem>>, vector<2x512xbf16>
    %c0_4 = arith.constant 0 : index
    %c0_5 = arith.constant 0 : index
    %5 = vector.load %arg4[%c0_4, %c0_5] : memref<512x256xbf16, #tpu.memory_space<vmem>>, vector<512x256xbf16>
    %cst = arith.constant dense<0.000000e+00> : vector<2x256xf32>
    %6 = tpu.matmul %4, %5, %cst {dimension_numbers = #tpu.dot_dimension_numbers<[1], [0], [0], [1], [0, 0, 1, 1], [], []>} : vector<2x512xbf16>, vector<512x256xbf16>, vector<2x256xf32> -> vector<2x256xf32>
    %7 = arith.addf %3, %6 : vector<2x256xf32>
    %c0_6 = arith.constant 0 : index
    %c0_7 = arith.constant 0 : index
    %8 = vector.load %arg6[%c0_6, %c0_7] : memref<2x256xf32, #tpu.memory_space<vmem>>, vector<2x256xf32>
    tpu.vector_store %arg6[%c0_6, %c0_7], %7 {strides = array<i32>} : memref<2x256xf32, #tpu.memory_space<vmem>>, vector<2x256xf32>,
    %c0_i32_8 = arith.constant 0 : i32
    %9 = arith.cmpi eq, %arg2, %c0_i32_8 : i32
    %10 = arith.extui %9 : i1 to i32
    %c0_i32_9 = arith.constant 0 : i32
    %11 = arith.cmpi ne, %10, %c0_i32_9 : i32
    scf.if %11 {
      %c0_10 = arith.constant 0 : index
      %c0_11 = arith.constant 0 : index
      %12 = vector.load %arg6[%c0_10, %c0_11] : memref<2x256xf32, #tpu.memory_space<vmem>>, vector<2x256xf32>
      %c0_12 = arith.constant 0 : index
      %c0_13 = arith.constant 0 : index
      %13 = vector.load %arg5[%c0_12, %c0_13] : memref<1x256xf32, #tpu.memory_space<vmem>>, vector<1x256xf32>
      %14 = vector.broadcast %13 : vector<1x256xf32> to vector<2x256xf32>
      %15 = arith.addf %12, %14 : vector<2x256xf32>
      %c0_14 = arith.constant 0 : index
      %c0_15 = arith.constant 0 : index
      %16 = vector.load %arg6[%c0_14, %c0_15] : memref<2x256xf32, #tpu.memory_space<vmem>>, vector<2x256xf32>
      tpu.vector_store %arg6[%c0_14, %c0_15], %15 {strides = array<i32>} : memref<2x256xf32, #tpu.memory_space<vmem>>, vector<2x256xf32>,
    } else {
    }
    return
  }
  func.func @transform_0(%arg0: i32, %arg1: i32, %arg2: i32) -> (i32, i32) {
    %c0_i32 = arith.constant 0 : i32
    return %arg0, %arg2 : i32, i32
  }
  func.func @transform_1(%arg0: i32, %arg1: i32, %arg2: i32) -> (i32, i32) {
    %c0_i32 = arith.constant 0 : i32
    return %arg2, %arg1 : i32, i32
  }
  func.func @transform_2(%arg0: i32, %arg1: i32, %arg2: i32) -> (i32, i32) {
    %c0_i32 = arith.constant 0 : i32
    %c0_i32_0 = arith.constant 0 : i32
    return %c0_i32, %arg1 : i32, i32
  }
  func.func @transform_3(%arg0: i32, %arg1: i32, %arg2: i32) -> (i32, i32) {
    %c0_i32 = arith.constant 0 : i32
    return %arg0, %arg1 : i32, i32
  }
}

module attributes {stable_mosaic.version = 11 : i64} {
  func.func @_log_softmax_kernel(%arg0: i32, %arg1: memref<2x4x128xf32, #tpu.memory_space<vmem>>, %arg2: memref<2x4x128xf32, #tpu.memory_space<vmem>>) attributes {dimension_semantics = [#tpu.dimension_semantics<arbitrary>], iteration_bounds = array<i64: 1>, scalar_prefetch = 0 : i64, scratch_operands = 0 : i64, tpu.core_type = #tpu.core_type<tc>, window_params = [{pipeline_mode = #tpu.pipeline_mode<synchronous>, transform_indices = @transform_0, window_bounds = array<i64: 2, 4, 128>}, {pipeline_mode = #tpu.pipeline_mode<synchronous>, transform_indices = @transform_1, window_bounds = array<i64: 2, 4, 128>}]} {
    %c0 = arith.constant 0 : index
    %c0_0 = arith.constant 0 : index
    %c0_1 = arith.constant 0 : index
    %0 = vector.load %arg1[%c0, %c0_0, %c0_1] : memref<2x4x128xf32, #tpu.memory_space<vmem>>, vector<2x4x128xf32>
    %cst = arith.constant dense<0xFF800000> : vector<2x128xf32>
    %1 = vector.multi_reduction <maximumf>, %0, %cst [1] : vector<2x4x128xf32> to vector<2x128xf32>
    %2 = vector.shape_cast %1 : vector<2x128xf32> to vector<2x1x128xf32>
    %3 = vector.broadcast %2 : vector<2x1x128xf32> to vector<2x4x128xf32>
    %4 = arith.subf %0, %3 : vector<2x4x128xf32>
    %5 = math.exp %4 : vector<2x4x128xf32>
    %cst_2 = arith.constant dense<0.000000e+00> : vector<2x128xf32>
    %6 = vector.multi_reduction <add>, %5, %cst_2 [1] : vector<2x4x128xf32> to vector<2x128xf32>
    %7 = vector.shape_cast %6 : vector<2x128xf32> to vector<2x1x128xf32>
    %8 = math.log %7 : vector<2x1x128xf32>
    %9 = vector.broadcast %8 : vector<2x1x128xf32> to vector<2x4x128xf32>
    %10 = arith.subf %4, %9 : vector<2x4x128xf32>
    %c0_3 = arith.constant 0 : index
    %c0_4 = arith.constant 0 : index
    %c0_5 = arith.constant 0 : index
    %11 = vector.load %arg2[%c0_3, %c0_4, %c0_5] : memref<2x4x128xf32, #tpu.memory_space<vmem>>, vector<2x4x128xf32>
    tpu.vector_store %arg2[%c0_3, %c0_4, %c0_5], %10 {strides = array<i32>} : memref<2x4x128xf32, #tpu.memory_space<vmem>>, vector<2x4x128xf32>,
    return
  }
  func.func @transform_0(%arg0: i32) -> (i32, i32, i32) {
    %c0_i32 = arith.constant 0 : i32
    %c0_i32_0 = arith.constant 0 : i32
    %c0_i32_1 = arith.constant 0 : i32
    %c0_i32_2 = arith.constant 0 : i32
    return %c0_i32, %c0_i32_0, %c0_i32_1 : i32, i32, i32
  }
  func.func @transform_1(%arg0: i32) -> (i32, i32, i32) {
    %c0_i32 = arith.constant 0 : i32
    %c0_i32_0 = arith.constant 0 : i32
    %c0_i32_1 = arith.constant 0 : i32
    %c0_i32_2 = arith.constant 0 : i32
    return %c0_i32, %c0_i32_0, %c0_i32_1 : i32, i32, i32
  }
}

</mosaic_0001>

<bundles_post_ra>
// kernel: convnet_forward.8
= control target key start
LH: loop header
LB: loop body
LE: loop exit
PB: predicated region body
PF: predicated region fallthrough
CT: control target
= control target key end

     0   :  { %8 = vsyncpa [#allocation3], 0  ;;  %s526_s15 = smov [#allocation2]   ;;  %s527_s17 = smov 64   ;;  %s584_s0 = inlined_call_operand.vmem [shape: bf16[16,256], index: 0, kind: input, shape index: {}]   ;;  %s585_s1 = inlined_call_operand.hbm [shape: bf16[384,128], index: 1, kind: input, shape index: {}]   ;;  %s586_s2 = inlined_call_operand.vmem [shape: f32[1,128], index: 2, kind: input, shape index: {}]   ;;  %s587_s3 = inlined_call_operand.vmem [shape: bf16[16,128], index: 3, kind: output, shape index: {}]  }
   0x1   :  { %s15_s14 = sshll.u32 %s585_s1, 4  ;;  %s17_s16 = sshll.u32 %s526_s15, 4  ;;  %s16_s14 = int_to_ptr.hbm [resolvable:$true] %s15_s14  ;;  %s18_s16 = int_to_ptr.vmem [resolvable:$true] %s17_s16 }
   0x2   :  { %s528_s18 = smov 4  }
   0x3   :  { %23 = dma.hbm_to_vmem [thread:$0]  %s16_s14, 3072, %s18_s16, [#allocation3], %s527_s17, %s527_s17, %s528_s18  }
   0x4   :  { %524 = dma.done.wait [#allocation3], 3072  }
   0x5   :  { %525 = vsyncadd [#allocation3], 4294964224  ;;  %v52_v0 = vlaneseq  ;;  %v473_v3 = vld [vmem:[#allocation2 + $0x38] sm:$0xff]  ;;  %v472_v6 = vld [vmem:[#allocation2 + $0x30] sm:$0xff]  ;;  %v529_v21 = vmov 0   ;;  %vm48_vm4 = vcmask 1040384  }
   0x6   :  { %v481_v4 = vld [vmem:[#allocation2 + $0x78] sm:$0xff]  ;;  %305 = vmatpush.bf16.msra.mxu0 %v473_v3  ;;  %v480_v7 = vld [vmem:[#allocation2 + $0x70] sm:$0xff]  ;;  %v471_v11 = vld [vmem:[#allocation2 + $0x28] sm:$0xff]  ;;  %v98_v37 = vunpack.c.l.b16 %v529_v21  ;;  %v99_v38 = vunpack.c.h.b16 %v529_v21  ;;  %vm49_vm5 = vsmask.f32 256 }
   0x7   :  { %v53_v1 = vshrl.u32 %v52_v0, 7  ;;  %v489_v5 = vld [vmem:[#allocation2 + $0xb8] sm:$0xff]  ;;  %319 = vmatpush.bf16.msra.mxu1 %v481_v4  ;;  %v488_v9 = vld [vmem:[#allocation2 + $0xb0] sm:$0xff]  ;;  %v479_v12 = vld [vmem:[#allocation2 + $0x68] sm:$0xff] }
   0x8   :  { %333 = vmatpush.bf16.msra.mxu2 %v489_v5  ;;  %v487_v14 = vld [vmem:[#allocation2 + $0xa8] sm:$0xff]  ;;  %v464_v15 = vld [vmem:[%s584_s0 + $0x4] sm:$0xf]  ;;  %v469_v24 = vld [vmem:[#allocation2 + $0x18] sm:$0xff] }
   0x9   :  { %v54_v2 = vadd.s32 8, %v53_v1  ;;  %v63_v8 = vand.u32 7, %v53_v1  ;;  %v358_v16 = vld [vmem:[%s584_s0 + $0x8] sm:$0xf0]  ;;  %v470_v17 = vld [vmem:[#allocation2 + $0x20] sm:$0xff]  ;;  %v477_v25 = vld [vmem:[#allocation2 + $0x58] sm:$0xff] }
   0xa   :  { %306 = vmatpush.bf16.msra.mxu0 %v472_v6  ;;  %v478_v18 = vld [vmem:[#allocation2 + $0x60] sm:$0xff]  ;;  %v361_v20 = vor.u32 %v464_v15, %v358_v16  ;;  %v485_v26 = vld [vmem:[#allocation2 + $0x98] sm:$0xff]  ;;  %v468_v30 = vld [vmem:[#allocation2 + $0x10] sm:$0xff] }
   0xb   :  { %v70_v10 = vand.u32 7, %v54_v2  ;;  %320 = vmatpush.bf16.msra.mxu1 %v480_v7  ;;  %vm553_vm0 = vcmp.eq.s32.totalorder %v63_v8, 0  ;;  %v486_v19 = vld [vmem:[#allocation2 + $0xa0] sm:$0xff]  ;;  %v476_v31 = vld [vmem:[#allocation2 + $0x50] sm:$0xff]  ;;  %v467_v39 = vld [vmem:[#allocation2 + $0x8] sm:$0xff] }
   0xc   :  { %334 = vmatpush.bf16.msra.mxu2 %v488_v9  ;;  %vm89_vm2 = vmpackc.low %vm553_vm0, %vm553_vm0  ;;  %v41_v27 = vshrl.u32 %v361_v20, 16  ;;  %v484_v32 = vld [vmem:[#allocation2 + $0x90] sm:$0xff]  ;;  %v44_v34 = vshll.u32 %v361_v20, 16  ;;  %v475_v40 = vld [vmem:[#allocation2 + $0x48] sm:$0xff] }
   0xd   :  { %vm84_vm1 = vcmp.eq.s32.totalorder %v70_v10, 0  ;;  %v91_v22 = vsel %vm89_vm2, 65537, %v529_v21  ;;  %v483_v41 = vld [vmem:[#allocation2 + $0x88] sm:$0xff]  ;;  %vm566_vm6 = vmand %vm48_vm4, %vm49_vm5  ;;  %v466_v44 = vld [vmem:[#allocation2] sm:$0xff] }
   0xe   :  { %307 = vmatpush.bf16.msra.mxu0 %v471_v11  ;;  %vm90_vm3 = vmpackc.low %vm84_vm1, %vm84_vm1  ;;  %v93_v28 = vunpack.c.l.b16 %v91_v22  ;;  %v43_v33 = vrot.slane %v41_v27, 7  ;;  %v474_v45 = vld [vmem:[#allocation2 + $0x40] sm:$0xff]  ;;  %v465_v47 = vld [vmem:[%s584_s0 + $0x4] sm:$0xf0] }
   0xf   :  { %321 = vmatpush.bf16.msra.mxu1 %v479_v12  ;;  %v92_v23 = vsel %vm90_vm3, 65537, %v529_v21  ;;  %v366_v46 = vld [vmem:[%s584_s0] sm:$0xf] }
  0x10   :  { %335 = vmatpush.bf16.msra.mxu2 %v487_v14  ;;  %v94_v29 = vunpack.c.l.b16 %v92_v23  ;;  %v362_v35 = vunpack.i.l.s16 %v93_v28  ;;  %v46_v42 = vor.u32 %v44_v34, %v43_v33  ;;  %v482_v48 = vld [vmem:[#allocation2 + $0x80] sm:$0xff]  ;;  %v367_v50 = vor.u32 %v465_v47, %v366_v46 }
  0x11   :  { %v499_v53 = vld [vmem:[%s586_s2] ss:$0 sm:$0xff] }
  0x12   :  { %308 = vmatpush.bf16.msra.mxu0 %v470_v17  ;;  %v363_v36 = vunpack.i.l.s16 %v94_v29  ;;  %vm100_vm7 = vcmp.ne.s32.totalorder %v362_v35, %v98_v37  ;;  %v51_v49 = vsel %vm566_vm6, 0, %v46_v42 }
  0x13   :  { %322 = vmatpush.bf16.msra.mxu1 %v478_v18 }
  0x14   :  { %336 = vmatpush.bf16.msra.mxu2 %v486_v19  ;;  %vm101_vm8 = vcmp.ne.s32.totalorder %v363_v36, %v99_v38 }
  0x15   :  { %vm102_vm9 = vmpackc.low %vm101_vm8, %vm100_vm7 }
  0x16   :  { %309 = vmatpush.bf16.msra.mxu0 %v469_v24  ;;  %v103_v51 = vsel %vm102_vm9, 0, %v51_v49 }
  0x17   :  { %323 = vmatpush.bf16.msra.mxu1 %v477_v25 }
  0x18   :  { %337 = vmatpush.bf16.msra.mxu2 %v485_v26 }
  0x1a   :  { %310 = vmatpush.bf16.msra.mxu0 %v468_v30 }
  0x1b   :  { %324 = vmatpush.bf16.msra.mxu1 %v476_v31 }
  0x1c   :  { %338 = vmatpush.bf16.msra.mxu2 %v484_v32 }
  0x1e   :  { %311 = vmatpush.bf16.msra.mxu0 %v467_v39 }
  0x1f   :  { %325 = vmatpush.bf16.msra.mxu1 %v475_v40 }
  0x20   :  { %339 = vmatpush.bf16.msra.mxu2 %v483_v41 }
  0x22   :  { %312 = vmatpush.bf16.msra.mxu0 %v466_v44 }
  0x23   :  { %326 = vmatpush.bf16.msra.mxu1 %v474_v45 }
  0x24   :  { %340 = vmatpush.bf16.msra.mxu2 %v482_v48 }
  0x25   :  { %313 = vmatmul.bf16.vlgmr.msra.gmra.mxu0 %v103_v51 }
  0x26   :  { %327 = vmatmul.bf16.vlgmr.msra.gmra.mxu1 %v367_v50 }
  0x27   :  { %341 = vmatmul.bf16.vlgmr.msra.gmra.mxu2 %v361_v20 }
  0xa2   :  { %v314_v52 = vpop.f32.mrf.mxu0 }
  0xa3   :  { %v328_v54 = vpop.f32.mrf.mxu1  ;;  %v315_v55 = vadd.f32 %v499_v53, %v314_v52 }
  0xa5   :  { %v329_v58 = vadd.f32 %v328_v54, %v315_v55 }
  0xaa   :  { %v342_v56 = vpop.f32.mrf.mxu2  ;;  %v316_v57 = vpop.f32.mrf.mxu0 }
  0xab   :  { %v317_v59 = vadd.f32 %v499_v53, %v316_v57  ;;  %v330_v60 = vpop.f32.mrf.mxu1  ;;  %v343_v61 = vadd.f32 %v342_v56, %v329_v58 }
  0xad   :  { %v331_v62 = vadd.f32 %v330_v60, %v317_v59  ;;  %v347_v1 = vmax.f32 %v343_v61, 0.0 }
  0xb2   :  { %v344_v63 = vpop.f32.mrf.mxu2 }
  0xb3   :  { %v345_v0 = vadd.f32 %v344_v63, %v331_v62 }
  0xb5   :  { %v348_v2 = vmax.f32 %v345_v0, 0.0 }
  0xb7   :  { %v493_v3 = vpack.c.bf16 %v348_v2, %v347_v1 }
  0xb9   :  { %494 = vst [vmem:[%s587_s3] sm:$0xff] %v493_v3  }
  0xba   :  { %357 = vsyncpa [#allocation3], 1 }

// kernel: convnet_forward.6
= control target key start
LH: loop header
LB: loop body
LE: loop exit
PB: predicated region body
PF: predicated region fallthrough
CT: control target
= control target key end

     0   :  { %v84_v0 = vlaneseq  ;;  %vm816_vm2 = vmmov 0   ;;  %v817_v22 = vmov 0   ;;  %vm45_vm4 = vsmask.f32 256  ;;  %s1036_s1 = inlined_call_operand.vmem [shape: bf16[384,128], index: 1, kind: input, shape index: {}]   ;;  %s1037_s0 = inlined_call_operand.vmem [shape: bf16[64,256], index: 0, kind: input, shape index: {}]   ;;  %s1038_s2 = inlined_call_operand.vmem [shape: f32[1,128], index: 2, kind: input, shape index: {}]   ;;  %s1039_s3 = inlined_call_operand.vmem [shape: bf16[64,128], index: 3, kind: output, shape index: {}]  }
   0x1   :  { %v765_v1 = vld [vmem:[%s1036_s1 + $0x38] sm:$0xff]  ;;  %v764_v5 = vld [vmem:[%s1036_s1 + $0x30] sm:$0xff]  ;;  %v763_v9 = vld [vmem:[%s1036_s1 + $0x28] sm:$0xff]  ;;  %v917_v35 = vunpack.c.l.b16 %v817_v22  ;;  %v924_v39 = vunpack.c.h.b16 %v817_v22  ;;  %vm81_vm5 = vcmask 1040384  }
   0x2   :  { %v773_v2 = vld [vmem:[%s1036_s1 + $0x78] sm:$0xff]  ;;  %v85_v4 = vshrl.u32 %v84_v0, 7  ;;  %499 = vmatpush.bf16.msra.mxu0 %v765_v1  ;;  %v772_v6 = vld [vmem:[%s1036_s1 + $0x70] sm:$0xff]  ;;  %805 = vmatpush.bf16.msra.mxu3 %v765_v1  ;;  %v771_v10 = vld [vmem:[%s1036_s1 + $0x68] sm:$0xff] }
   0x3   :  { %v781_v3 = vld [vmem:[%s1036_s1 + $0xb8] sm:$0xff]  ;;  %528 = vmatpush.bf16.msra.mxu1 %v773_v2  ;;  %v780_v7 = vld [vmem:[%s1036_s1 + $0xb0] sm:$0xff]  ;;  %v779_v12 = vld [vmem:[%s1036_s1 + $0xa8] sm:$0xff] }
   0x4   :  { %557 = vmatpush.bf16.msra.mxu2 %v781_v3  ;;  %v107_v8 = vand.u32 31, %v85_v4  ;;  %v750_v13 = vld [vmem:[%s1037_s0 + $0x4] sm:$0xf]  ;;  %v614_v14 = vld [vmem:[%s1037_s0 + $0x8] sm:$0xf0]  ;;  %vm224_vm3 = vmpackc.low %vm816_vm2, %vm816_vm2  ;;  %v89_v29 = vadd.s32 32, %v85_v4 }
   0x5   :  { %v762_v15 = vld [vmem:[%s1036_s1 + $0x20] sm:$0xff]  ;;  %v752_v17 = vld [vmem:[%s1037_s0 + $0x14] sm:$0xf]  ;;  %v618_v18 = vld [vmem:[%s1037_s0 + $0x18] sm:$0xf0]  ;;  %v893_v20 = vor.u32 %v750_v13, %v614_v14  ;;  %v232_v24 = vsel %vm224_vm3, 65537, %v817_v22 }
   0x6   :  { %500 = vmatpush.bf16.msra.mxu0 %v764_v5  ;;  %vm862_vm0 = vcmp.eq.s32.totalorder %v107_v8, 0  ;;  %806 = vmatpush.bf16.msra.mxu3 %v764_v5  ;;  %v770_v16 = vld [vmem:[%s1036_s1 + $0x60] sm:$0xff]  ;;  %v895_v21 = vor.u32 %v752_v17, %v618_v18  ;;  %v761_v25 = vld [vmem:[%s1036_s1 + $0x18] sm:$0xff]  ;;  %v240_v31 = vunpack.c.l.b16 %v232_v24  ;;  %v760_v33 = vld [vmem:[%s1036_s1 + $0x10] sm:$0xff]  ;;  %v135_v40 = vand.u32 31, %v89_v29 }
   0x7   :  { %529 = vmatpush.bf16.msra.mxu1 %v772_v6  ;;  %vm223_vm1 = vmpackc.low %vm862_vm0, %vm862_vm0  ;;  %v778_v19 = vld [vmem:[%s1036_s1 + $0xa0] sm:$0xff]  ;;  %v769_v26 = vld [vmem:[%s1036_s1 + $0x58] sm:$0xff]  ;;  %v47_v28 = vshrl.u32 %v893_v20, 16  ;;  %v50_v38 = vshll.u32 %v893_v20, 16 }
   0x8   :  { %558 = vmatpush.bf16.msra.mxu2 %v780_v7  ;;  %v231_v23 = vsel %vm223_vm1, 65537, %v817_v22  ;;  %v777_v27 = vld [vmem:[%s1036_s1 + $0x98] sm:$0xff]  ;;  %v54_v32 = vshrl.u32 %v895_v21, 16  ;;  %v768_v34 = vld [vmem:[%s1036_s1 + $0x50] sm:$0xff]  ;;  %v631_v42 = vunpack.i.l.s16 %v240_v31  ;;  %v57_v44 = vshll.u32 %v895_v21, 16  ;;  %v759_v45 = vld [vmem:[%s1036_s1 + $0x8] sm:$0xff] }
   0x9   :  { %v239_v30 = vunpack.c.l.b16 %v231_v23  ;;  %v776_v36 = vld [vmem:[%s1036_s1 + $0x90] sm:$0xff]  ;;  %v49_v37 = vrot.slane %v47_v28, 7  ;;  %v767_v46 = vld [vmem:[%s1036_s1 + $0x48] sm:$0xff]  ;;  %vm936_vm6 = vcmp.eq.s32.totalorder %v135_v40, 0  ;;  %v758_v50 = vld [vmem:[%s1036_s1] sm:$0xff] }
   0xa   :  { %501 = vmatpush.bf16.msra.mxu0 %v763_v9  ;;  %807 = vmatpush.bf16.msra.mxu3 %v763_v9  ;;  %v56_v43 = vrot.slane %v54_v32, 7  ;;  %v775_v47 = vld [vmem:[%s1036_s1 + $0x88] sm:$0xff]  ;;  %vm944_vm7 = vmand %vm81_vm5, %vm45_vm4  ;;  %vm256_vm9 = vcmp.ne.s32.totalorder %v631_v42, %v924_v39  ;;  %v766_v53 = vld [vmem:[%s1036_s1 + $0x40] sm:$0xff]  ;;  %vm262_vm10 = vcmp.ne.s32.totalorder %v631_v42, %v917_v35 }
   0xb   :  { %530 = vmatpush.bf16.msra.mxu1 %v771_v10  ;;  %v630_v41 = vunpack.i.l.s16 %v239_v30  ;;  %v52_v48 = vor.u32 %v50_v38, %v49_v37  ;;  %v754_v54 = vld [vmem:[%s1037_s0 + $0x24] sm:$0xf]  ;;  %v622_v55 = vld [vmem:[%s1037_s0 + $0x28] sm:$0xf0]  ;;  %v640_v56 = vld [vmem:[%s1037_s0] sm:$0xf] }
   0xc   :  { %559 = vmatpush.bf16.msra.mxu2 %v779_v12  ;;  %v59_v52 = vor.u32 %v57_v44, %v56_v43  ;;  %v751_v57 = vld [vmem:[%s1037_s0 + $0x4] sm:$0xf0]  ;;  %vm227_vm11 = vmpackc.low %vm936_vm6, %vm936_vm6  ;;  %v774_v58 = vld [vmem:[%s1036_s1 + $0x80] sm:$0xff]  ;;  %v625_v62 = vor.u32 %v754_v54, %v622_v55 }
   0xd   :  { %vm255_vm8 = vcmp.ne.s32.totalorder %v630_v41, %v917_v35  ;;  %v83_v59 = vsel %vm944_vm7, 0, %v52_v48  ;;  %vm981_vm13 = vmpackc.low %vm256_vm9, %vm262_vm10  ;;  %v641_v63 = vor.u32 %v751_v57, %v640_v56  ;;  %v235_v1 = vsel %vm227_vm11, 65537, %v817_v22  ;;  %v756_v9 = vld [vmem:[%s1037_s0 + $0x34] sm:$0xf]  ;;  %v626_v10 = vld [vmem:[%s1037_s0 + $0x38] sm:$0xf0] }
   0xe   :  { %502 = vmatpush.bf16.msra.mxu0 %v762_v15  ;;  %808 = vmatpush.bf16.msra.mxu3 %v762_v15  ;;  %vm257_vm12 = vmpackc.low %vm256_vm9, %vm255_vm8  ;;  %v60_v60 = vsel %vm45_vm4, %v49_v37, %v59_v52  ;;  %v62_v3 = vshrl.u32 %v625_v62, 16  ;;  %v243_v4 = vunpack.c.l.b16 %v235_v1  ;;  %v65_v6 = vshll.u32 %v625_v62, 16  ;;  %v644_v11 = vld [vmem:[%s1037_s0 + $0x10] sm:$0xf]  ;;  %v753_v12 = vld [vmem:[%s1037_s0 + $0x14] sm:$0xf0] }
   0xf   :  { %531 = vmatpush.bf16.msra.mxu1 %v770_v16  ;;  %v279_v0 = vsel %vm257_vm12, 0, %v83_v59  ;;  %v280_v2 = vsel %vm981_vm13, 0, %v60_v60  ;;  %v629_v14 = vor.u32 %v756_v9, %v626_v10  ;;  %v645_v15 = vor.u32 %v753_v12, %v644_v11  ;;  %v648_v22 = vld [vmem:[%s1037_s0 + $0x20] sm:$0xf]  ;;  %v755_v23 = vld [vmem:[%s1037_s0 + $0x24] sm:$0xf0] }
  0x10   :  { %560 = vmatpush.bf16.msra.mxu2 %v778_v19  ;;  %v64_v5 = vrot.slane %v62_v3, 7  ;;  %v634_v7 = vunpack.i.l.s16 %v243_v4  ;;  %v815_v31 = vld [vmem:[%s1038_s2] ss:$0 sm:$0xff] }
  0x11   :  { %v70_v17 = vshrl.u32 %v629_v14, 16  ;;  %v73_v19 = vshll.u32 %v629_v14, 16 }
  0x12   :  { %503 = vmatpush.bf16.msra.mxu0 %v761_v25  ;;  %809 = vmatpush.bf16.msra.mxu3 %v761_v25  ;;  %v67_v8 = vor.u32 %v65_v6, %v64_v5  ;;  %vm269_vm14 = vcmp.ne.s32.totalorder %v634_v7, %v917_v35  ;;  %v649_v25 = vor.u32 %v755_v23, %v648_v22 }
  0x13   :  { %532 = vmatpush.bf16.msra.mxu1 %v769_v26  ;;  %vm271_vm15 = vmpackc.low %vm256_vm9, %vm269_vm14  ;;  %v72_v18 = vrot.slane %v70_v17, 7 }
  0x14   :  { %561 = vmatpush.bf16.msra.mxu2 %v777_v27  ;;  %v68_v13 = vsel %vm45_vm4, %v56_v43, %v67_v8  ;;  %v757_v27 = vld [vmem:[%s1037_s0 + $0x34] sm:$0xf0] }
  0x15   :  { %v281_v16 = vsel %vm271_vm15, 0, %v68_v13 }
  0x16   :  { %504 = vmatpush.bf16.msra.mxu0 %v760_v33  ;;  %810 = vmatpush.bf16.msra.mxu3 %v760_v33 }
  0x17   :  { %533 = vmatpush.bf16.msra.mxu1 %v768_v34 }
  0x18   :  { %562 = vmatpush.bf16.msra.mxu2 %v776_v36 }
  0x1a   :  { %505 = vmatpush.bf16.msra.mxu0 %v759_v45  ;;  %811 = vmatpush.bf16.msra.mxu3 %v759_v45 }
  0x1b   :  { %534 = vmatpush.bf16.msra.mxu1 %v767_v46 }
  0x1c   :  { %563 = vmatpush.bf16.msra.mxu2 %v775_v47 }
  0x1e   :  { %506 = vmatpush.bf16.msra.mxu0 %v758_v50  ;;  %812 = vmatpush.bf16.msra.mxu3 %v758_v50 }
  0x1f   :  { %535 = vmatpush.bf16.msra.mxu1 %v766_v53 }
  0x20   :  { %564 = vmatpush.bf16.msra.mxu2 %v774_v58 }
  0x21   :  { %507 = vmatmul.bf16.vlgmr.msra.gmra.mxu0 %v279_v0  ;;  %512 = vmatmul.bf16.vlgmr.msra.gmra.mxu3 %v280_v2 }
  0x22   :  { %536 = vmatmul.bf16.vlgmr.msra.gmra.mxu1 %v641_v63 }
  0x23   :  { %565 = vmatmul.bf16.vlgmr.msra.gmra.mxu2 %v893_v20  ;;  %v75_v20 = vor.u32 %v73_v19, %v72_v18 }
  0x25   :  { %v76_v24 = vsel %vm45_vm4, %v64_v5, %v75_v20 }
  0x26   :  { %v282_v26 = vsel %vm981_vm13, 0, %v76_v24 }
  0x31   :  { %517 = vmatmul.bf16.gmra.mxu3 %v281_v16 }
  0x32   :  { %541 = vmatmul.bf16.gmra.mxu1 %v645_v15 }
  0x33   :  { %570 = vmatmul.bf16.gmra.mxu2 %v895_v21  ;;  %v652_v21 = vld [vmem:[%s1037_s0 + $0x30] sm:$0xf] }
  0x34   :  { %v653_v28 = vor.u32 %v757_v27, %v652_v21 }
  0x41   :  { %522 = vmatmul.bf16.gmra.mxu3 %v282_v26 }
  0x42   :  { %546 = vmatmul.bf16.gmra.mxu1 %v649_v25 }
  0x43   :  { %575 = vmatmul.bf16.gmra.mxu2 %v625_v62 }
  0x52   :  { %551 = vmatmul.bf16.gmra.mxu1 %v653_v28 }
  0x53   :  { %580 = vmatmul.bf16.gmra.mxu2 %v629_v14 }
  0x9e   :  { %v508_v29 = vpop.f32.mrf.mxu0 }
  0x9f   :  { %v537_v30 = vpop.f32.mrf.mxu1  ;;  %v509_v32 = vadd.f32 %v815_v31, %v508_v29 }
  0xa1   :  { %v538_v37 = vadd.f32 %v537_v30, %v509_v32 }
  0xa4   :  { %v513_v34 = vpop.f32.mrf.mxu3 }
  0xa5   :  { %v514_v48 = vadd.f32 %v815_v31, %v513_v34 }
  0xa6   :  { %v566_v33 = vpop.f32.mrf.mxu2  ;;  %v510_v35 = vpop.f32.mrf.mxu0 }
  0xa7   :  { %v539_v36 = vpop.f32.mrf.mxu1  ;;  %v511_v38 = vadd.f32 %v815_v31, %v510_v35  ;;  %v567_v39 = vadd.f32 %v566_v33, %v538_v37 }
  0xa9   :  { %v540_v40 = vadd.f32 %v539_v36, %v511_v38  ;;  %v586_v45 = vmax.f32 %v567_v39, 0.0 }
  0xac   :  { %v515_v44 = vpop.f32.mrf.mxu3 }
  0xad   :  { %v516_v53 = vadd.f32 %v815_v31, %v515_v44 }
  0xae   :  { %v568_v41 = vpop.f32.mrf.mxu2 }
  0xaf   :  { %v569_v42 = vadd.f32 %v568_v41, %v540_v40  ;;  %v542_v43 = vpop.f32.mrf.mxu1 }
  0xb0   :  { %v543_v51 = vadd.f32 %v542_v43, %v514_v48 }
  0xb1   :  { %v587_v46 = vmax.f32 %v569_v42, 0.0 }
  0xb3   :  { %v785_v47 = vpack.c.bf16 %v587_v46, %v586_v45 }
  0xb4   :  { %v518_v52 = vpop.f32.mrf.mxu3 }
  0xb5   :  { %786 = vst [vmem:[%s1039_s3] sm:$0xff] %v785_v47   ;;  %v519_v63 = vadd.f32 %v815_v31, %v518_v52 }
  0xb6   :  { %v571_v49 = vpop.f32.mrf.mxu2 }
  0xb7   :  { %v544_v50 = vpop.f32.mrf.mxu1  ;;  %v572_v54 = vadd.f32 %v571_v49, %v543_v51 }
  0xb8   :  { %v545_v55 = vadd.f32 %v544_v50, %v516_v53 }
  0xb9   :  { %v588_v59 = vmax.f32 %v572_v54, 0.0 }
  0xbc   :  { %v520_v62 = vpop.f32.mrf.mxu3 }
  0xbd   :  { %v521_v3 = vadd.f32 %v815_v31, %v520_v62 }
  0xbe   :  { %v573_v56 = vpop.f32.mrf.mxu2 }
  0xbf   :  { %v574_v57 = vadd.f32 %v573_v56, %v545_v55  ;;  %v547_v58 = vpop.f32.mrf.mxu1 }
  0xc0   :  { %v548_v2 = vadd.f32 %v547_v58, %v519_v63 }
  0xc1   :  { %v589_v60 = vmax.f32 %v574_v57, 0.0 }
  0xc3   :  { %v790_v61 = vpack.c.bf16 %v589_v60, %v588_v59 }
  0xc4   :  { %v523_v6 = vpop.f32.mrf.mxu3 }
  0xc5   :  { %802 = vst [vmem:[%s1039_s3 + $0x8] sm:$0xff] %v790_v61   ;;  %v524_v13 = vadd.f32 %v815_v31, %v523_v6 }
  0xc6   :  { %v576_v0 = vpop.f32.mrf.mxu2 }
  0xc7   :  { %v549_v1 = vpop.f32.mrf.mxu1  ;;  %v577_v4 = vadd.f32 %v576_v0, %v548_v2 }
  0xc8   :  { %v550_v5 = vadd.f32 %v549_v1, %v521_v3 }
  0xc9   :  { %v590_v10 = vmax.f32 %v577_v4, 0.0 }
  0xcc   :  { %v525_v15 = vpop.f32.mrf.mxu3 }
  0xcd   :  { %v526_v18 = vadd.f32 %v815_v31, %v525_v15 }
  0xce   :  { %v578_v7 = vpop.f32.mrf.mxu2 }
  0xcf   :  { %v579_v8 = vadd.f32 %v578_v7, %v550_v5  ;;  %v552_v9 = vpop.f32.mrf.mxu1 }
  0xd0   :  { %v553_v16 = vadd.f32 %v552_v9, %v524_v13 }
  0xd1   :  { %v591_v11 = vmax.f32 %v579_v8, 0.0 }
  0xd3   :  { %v795_v12 = vpack.c.bf16 %v591_v11, %v590_v10 }
  0xd5   :  { %803 = vst [vmem:[%s1039_s3 + $0x10] sm:$0xff] %v795_v12  }
  0xd6   :  { %v581_v14 = vpop.f32.mrf.mxu2 }
  0xd7   :  { %v554_v17 = vpop.f32.mrf.mxu1  ;;  %v582_v19 = vadd.f32 %v581_v14, %v553_v16 }
  0xd8   :  { %v555_v20 = vadd.f32 %v554_v17, %v526_v18 }
  0xd9   :  { %v592_v24 = vmax.f32 %v582_v19, 0.0 }
  0xde   :  { %v583_v22 = vpop.f32.mrf.mxu2 }
  0xdf   :  { %v584_v23 = vadd.f32 %v583_v22, %v555_v20 }
  0xe1   :  { %v593_v25 = vmax.f32 %v584_v23, 0.0 }
  0xe3   :  { %v800_v26 = vpack.c.bf16 %v593_v25, %v592_v24 }
  0xe5   :  { %804 = vst [vmem:[%s1039_s3 + $0x18] sm:$0xff] %v800_v26  }

// kernel: convnet_forward.7
= control target key start
LH: loop header
LB: loop body
LE: loop exit
PB: predicated region body
PF: predicated region fallthrough
CT: control target
= control target key end

     0   :  { %v52_v0 = vlaneseq  ;;  %vm598_vm3 = vmmov 0   ;;  %v599_v25 = vmov 0   ;;  %vm31_vm6 = vsmask.f32 256  ;;  %s759_s1 = inlined_call_operand.vmem [shape: bf16[384,128], index: 1, kind: input, shape index: {}]   ;;  %s760_s0 = inlined_call_operand.vmem [shape: bf16[32,256], index: 0, kind: input, shape index: {}]   ;;  %s761_s2 = inlined_call_operand.vmem [shape: f32[1,128], index: 2, kind: input, shape index: {}]   ;;  %s762_s3 = inlined_call_operand.vmem [shape: bf16[32,128], index: 3, kind: output, shape index: {}]  }
   0x1   :  { %v559_v1 = vld [vmem:[%s759_s1 + $0x38] sm:$0xff]  ;;  %v558_v5 = vld [vmem:[%s759_s1 + $0x30] sm:$0xff]  ;;  %v557_v11 = vld [vmem:[%s759_s1 + $0x28] sm:$0xff]  ;;  %v139_v42 = vunpack.c.l.b16 %v599_v25  ;;  %v140_v43 = vunpack.c.h.b16 %v599_v25  ;;  %vm49_vm7 = vcmask 1040384  }
   0x2   :  { %v567_v2 = vld [vmem:[%s759_s1 + $0x78] sm:$0xff]  ;;  %v53_v4 = vshrl.u32 %v52_v0, 7  ;;  %359 = vmatpush.bf16.msra.mxu0 %v559_v1  ;;  %v566_v6 = vld [vmem:[%s759_s1 + $0x70] sm:$0xff]  ;;  %587 = vmatpush.bf16.msra.mxu3 %v559_v1  ;;  %v565_v12 = vld [vmem:[%s759_s1 + $0x68] sm:$0xff] }
   0x3   :  { %v575_v3 = vld [vmem:[%s759_s1 + $0xb8] sm:$0xff]  ;;  %378 = vmatpush.bf16.msra.mxu1 %v567_v2  ;;  %v574_v7 = vld [vmem:[%s759_s1 + $0xb0] sm:$0xff]  ;;  %v573_v14 = vld [vmem:[%s759_s1 + $0xa8] sm:$0xff] }
   0x4   :  { %397 = vmatpush.bf16.msra.mxu2 %v575_v3  ;;  %v67_v8 = vand.u32 15, %v53_v4  ;;  %v55_v9 = vadd.s32 16, %v53_v4  ;;  %v548_v15 = vld [vmem:[%s760_s0 + $0x4] sm:$0xf]  ;;  %v432_v16 = vld [vmem:[%s760_s0 + $0x8] sm:$0xf0]  ;;  %vm124_vm4 = vmpackc.low %vm598_vm3, %vm598_vm3 }
   0x5   :  { %v556_v18 = vld [vmem:[%s759_s1 + $0x20] sm:$0xff]  ;;  %v550_v20 = vld [vmem:[%s760_s0 + $0x14] sm:$0xf]  ;;  %v436_v21 = vld [vmem:[%s760_s0 + $0x18] sm:$0xf0]  ;;  %v679_v23 = vor.u32 %v548_v15, %v432_v16  ;;  %v128_v27 = vsel %vm124_vm4, 65537, %v599_v25 }
   0x6   :  { %v81_v10 = vand.u32 15, %v55_v9  ;;  %360 = vmatpush.bf16.msra.mxu0 %v558_v5  ;;  %vm644_vm0 = vcmp.eq.s32.totalorder %v67_v8, 0  ;;  %588 = vmatpush.bf16.msra.mxu3 %v558_v5  ;;  %v564_v19 = vld [vmem:[%s759_s1 + $0x60] sm:$0xff]  ;;  %v684_v24 = vor.u32 %v550_v20, %v436_v21  ;;  %v555_v28 = vld [vmem:[%s759_s1 + $0x18] sm:$0xff]  ;;  %v132_v34 = vunpack.c.l.b16 %v128_v27  ;;  %v554_v37 = vld [vmem:[%s759_s1 + $0x10] sm:$0xff] }
   0x7   :  { %379 = vmatpush.bf16.msra.mxu1 %v566_v6  ;;  %vm123_vm2 = vmpackc.low %vm644_vm0, %vm644_vm0  ;;  %v572_v22 = vld [vmem:[%s759_s1 + $0xa0] sm:$0xff]  ;;  %v563_v29 = vld [vmem:[%s759_s1 + $0x58] sm:$0xff]  ;;  %v33_v32 = vshrl.u32 %v679_v23, 16  ;;  %v36_v41 = vshll.u32 %v679_v23, 16 }
   0x8   :  { %398 = vmatpush.bf16.msra.mxu2 %v574_v7  ;;  %vm657_vm1 = vcmp.eq.s32.totalorder %v81_v10, 0  ;;  %v127_v26 = vsel %vm123_vm2, 65537, %v599_v25  ;;  %v571_v31 = vld [vmem:[%s759_s1 + $0x98] sm:$0xff]  ;;  %v40_v35 = vshrl.u32 %v684_v24, 16  ;;  %v562_v38 = vld [vmem:[%s759_s1 + $0x50] sm:$0xff]  ;;  %v441_v45 = vunpack.i.l.s16 %v132_v34  ;;  %v553_v49 = vld [vmem:[%s759_s1 + $0x8] sm:$0xff] }
   0x9   :  { %vm125_vm5 = vmpackc.low %vm657_vm1, %vm657_vm1  ;;  %v131_v33 = vunpack.c.l.b16 %v127_v26  ;;  %v570_v39 = vld [vmem:[%s759_s1 + $0x90] sm:$0xff]  ;;  %v35_v40 = vrot.slane %v33_v32, 7  ;;  %v43_v47 = vshll.u32 %v684_v24, 16  ;;  %v561_v50 = vld [vmem:[%s759_s1 + $0x48] sm:$0xff] }
   0xa   :  { %361 = vmatpush.bf16.msra.mxu0 %v557_v11  ;;  %589 = vmatpush.bf16.msra.mxu3 %v557_v11  ;;  %v129_v30 = vsel %vm125_vm5, 65537, %v599_v25  ;;  %v42_v46 = vrot.slane %v40_v35, 7  ;;  %v569_v51 = vld [vmem:[%s759_s1 + $0x88] sm:$0xff]  ;;  %vm718_vm8 = vmand %vm49_vm7, %vm31_vm6  ;;  %vm142_vm10 = vcmp.ne.s32.totalorder %v441_v45, %v140_v43  ;;  %v552_v55 = vld [vmem:[%s759_s1] sm:$0xff] }
   0xb   :  { %380 = vmatpush.bf16.msra.mxu1 %v565_v12  ;;  %v133_v36 = vunpack.c.l.b16 %v129_v30  ;;  %v440_v44 = vunpack.i.l.s16 %v131_v33  ;;  %v38_v52 = vor.u32 %v36_v41, %v35_v40  ;;  %v560_v56 = vld [vmem:[%s759_s1 + $0x40] sm:$0xff]  ;;  %v549_v58 = vld [vmem:[%s760_s0 + $0x4] sm:$0xf0]  ;;  %v450_v1 = vld [vmem:[%s760_s0 + $0x10] sm:$0xf] }
   0xc   :  { %399 = vmatpush.bf16.msra.mxu2 %v573_v14  ;;  %v45_v54 = vor.u32 %v43_v47, %v42_v46  ;;  %v446_v57 = vld [vmem:[%s760_s0] sm:$0xf]  ;;  %v551_v2 = vld [vmem:[%s760_s0 + $0x14] sm:$0xf0] }
   0xd   :  { %v442_v48 = vunpack.i.l.s16 %v133_v36  ;;  %vm141_vm9 = vcmp.ne.s32.totalorder %v440_v44, %v139_v42  ;;  %v568_v59 = vld [vmem:[%s759_s1 + $0x80] sm:$0xff]  ;;  %v51_v60 = vsel %vm718_vm8, 0, %v38_v52  ;;  %v447_v62 = vor.u32 %v549_v58, %v446_v57 }
   0xe   :  { %362 = vmatpush.bf16.msra.mxu0 %v556_v18  ;;  %590 = vmatpush.bf16.msra.mxu3 %v556_v18  ;;  %vm143_vm12 = vmpackc.low %vm142_vm10, %vm141_vm9  ;;  %v46_v61 = vsel %vm31_vm6, %v35_v40, %v45_v54  ;;  %v451_v3 = vor.u32 %v551_v2, %v450_v1  ;;  %v597_v6 = vld [vmem:[%s761_s2] ss:$0 sm:$0xff] }
   0xf   :  { %381 = vmatpush.bf16.msra.mxu1 %v564_v19  ;;  %vm148_vm11 = vcmp.ne.s32.totalorder %v442_v48, %v139_v42  ;;  %v151_v63 = vsel %vm143_vm12, 0, %v51_v60 }
  0x10   :  { %400 = vmatpush.bf16.msra.mxu2 %v572_v22  ;;  %vm150_vm13 = vmpackc.low %vm142_vm10, %vm148_vm11 }
  0x11   :  { %v152_v0 = vsel %vm150_vm13, 0, %v46_v61 }
  0x12   :  { %363 = vmatpush.bf16.msra.mxu0 %v555_v28  ;;  %591 = vmatpush.bf16.msra.mxu3 %v555_v28 }
  0x13   :  { %382 = vmatpush.bf16.msra.mxu1 %v563_v29 }
  0x14   :  { %401 = vmatpush.bf16.msra.mxu2 %v571_v31 }
  0x16   :  { %364 = vmatpush.bf16.msra.mxu0 %v554_v37  ;;  %592 = vmatpush.bf16.msra.mxu3 %v554_v37 }
  0x17   :  { %383 = vmatpush.bf16.msra.mxu1 %v562_v38 }
  0x18   :  { %402 = vmatpush.bf16.msra.mxu2 %v570_v39 }
  0x1a   :  { %365 = vmatpush.bf16.msra.mxu0 %v553_v49  ;;  %593 = vmatpush.bf16.msra.mxu3 %v553_v49 }
  0x1b   :  { %384 = vmatpush.bf16.msra.mxu1 %v561_v50 }
  0x1c   :  { %403 = vmatpush.bf16.msra.mxu2 %v569_v51 }
  0x1e   :  { %366 = vmatpush.bf16.msra.mxu0 %v552_v55  ;;  %594 = vmatpush.bf16.msra.mxu3 %v552_v55 }
  0x1f   :  { %385 = vmatpush.bf16.msra.mxu1 %v560_v56 }
  0x20   :  { %404 = vmatpush.bf16.msra.mxu2 %v568_v59 }
  0x21   :  { %367 = vmatmul.bf16.vlgmr.msra.gmra.mxu0 %v151_v63  ;;  %372 = vmatmul.bf16.vlgmr.msra.gmra.mxu3 %v152_v0 }
  0x22   :  { %386 = vmatmul.bf16.vlgmr.msra.gmra.mxu1 %v447_v62 }
  0x23   :  { %405 = vmatmul.bf16.vlgmr.msra.gmra.mxu2 %v679_v23 }
  0x32   :  { %391 = vmatmul.bf16.gmra.mxu1 %v451_v3 }
  0x33   :  { %410 = vmatmul.bf16.gmra.mxu2 %v684_v24 }
  0x9e   :  { %v368_v4 = vpop.f32.mrf.mxu0 }
  0x9f   :  { %v387_v5 = vpop.f32.mrf.mxu1  ;;  %v369_v7 = vadd.f32 %v597_v6, %v368_v4 }
  0xa1   :  { %v388_v11 = vadd.f32 %v387_v5, %v369_v7 }
  0xa4   :  { %v373_v15 = vpop.f32.mrf.mxu3 }
  0xa5   :  { %v374_v22 = vadd.f32 %v597_v6, %v373_v15 }
  0xa6   :  { %v406_v8 = vpop.f32.mrf.mxu2  ;;  %v370_v9 = vpop.f32.mrf.mxu0 }
  0xa7   :  { %v389_v10 = vpop.f32.mrf.mxu1  ;;  %v371_v12 = vadd.f32 %v597_v6, %v370_v9  ;;  %v407_v13 = vadd.f32 %v406_v8, %v388_v11 }
  0xa9   :  { %v390_v14 = vadd.f32 %v389_v10, %v371_v12  ;;  %v416_v19 = vmax.f32 %v407_v13, 0.0 }
  0xac   :  { %v375_v24 = vpop.f32.mrf.mxu3 }
  0xad   :  { %v376_v27 = vadd.f32 %v597_v6, %v375_v24 }
  0xae   :  { %v408_v16 = vpop.f32.mrf.mxu2 }
  0xaf   :  { %v409_v17 = vadd.f32 %v408_v16, %v390_v14  ;;  %v392_v18 = vpop.f32.mrf.mxu1 }
  0xb0   :  { %v393_v25 = vadd.f32 %v392_v18, %v374_v22 }
  0xb1   :  { %v417_v20 = vmax.f32 %v409_v17, 0.0 }
  0xb3   :  { %v579_v21 = vpack.c.bf16 %v417_v20, %v416_v19 }
  0xb5   :  { %580 = vst [vmem:[%s762_s3] sm:$0xff] %v579_v21  }
  0xb6   :  { %v411_v23 = vpop.f32.mrf.mxu2 }
  0xb7   :  { %v394_v26 = vpop.f32.mrf.mxu1  ;;  %v412_v28 = vadd.f32 %v411_v23, %v393_v25 }
  0xb8   :  { %v395_v29 = vadd.f32 %v394_v26, %v376_v27 }
  0xb9   :  { %v418_v32 = vmax.f32 %v412_v28, 0.0 }
  0xbe   :  { %v413_v30 = vpop.f32.mrf.mxu2 }
  0xbf   :  { %v414_v31 = vadd.f32 %v413_v30, %v395_v29 }
  0xc1   :  { %v419_v33 = vmax.f32 %v414_v31, 0.0 }
  0xc3   :  { %v584_v34 = vpack.c.bf16 %v419_v33, %v418_v32 }
  0xc5   :  { %586 = vst [vmem:[%s762_s3 + $0x8] sm:$0xff] %v584_v34  }

// kernel: convnet_forward.9
= control target key start
LH: loop header
LB: loop body
LE: loop exit
PB: predicated region body
PF: predicated region fallthrough
CT: control target
= control target key end

     0   :  { %8 = vsyncpa [#allocation3], 0  ;;  %s466_s15 = smov [#allocation2]   ;;  %s467_s17 = smov 64   ;;  %s501_s0 = inlined_call_operand.vmem [shape: bf16[8,256], index: 0, kind: input, shape index: {}]   ;;  %s502_s1 = inlined_call_operand.hbm [shape: bf16[384,128], index: 1, kind: input, shape index: {}]   ;;  %s503_s2 = inlined_call_operand.vmem [shape: f32[1,128], index: 2, kind: input, shape index: {}]   ;;  %s504_s3 = inlined_call_operand.vmem [shape: bf16[8,128], index: 3, kind: output, shape index: {}]  }
   0x1   :  { %s15_s14 = sshll.u32 %s502_s1, 4  ;;  %s17_s16 = sshll.u32 %s466_s15, 4  ;;  %s16_s14 = int_to_ptr.hbm [resolvable:$true] %s15_s14  ;;  %s18_s16 = int_to_ptr.vmem [resolvable:$true] %s17_s16 }
   0x2   :  { %s468_s18 = smov 4  }
   0x3   :  { %23 = dma.hbm_to_vmem [thread:$0]  %s16_s14, 3072, %s18_s16, [#allocation3], %s467_s17, %s467_s17, %s468_s18  }
   0x4   :  { %464 = dma.done.wait [#allocation3], 3072  }
   0x5   :  { %465 = vsyncadd [#allocation3], 4294964224  ;;  %v419_v0 = vld [vmem:[#allocation2 + $0x38] sm:$0xff]  ;;  %v418_v3 = vld [vmem:[#allocation2 + $0x30] sm:$0xff]  ;;  %v47_v15 = vlaneseq  ;;  %vm43_vm0 = vcmask 1040384  }
   0x6   :  { %v427_v1 = vld [vmem:[#allocation2 + $0x78] sm:$0xff]  ;;  %269 = vmatpush.bf16.msra.mxu0 %v419_v0  ;;  %v426_v4 = vld [vmem:[#allocation2 + $0x70] sm:$0xff]  ;;  %v417_v6 = vld [vmem:[#allocation2 + $0x28] sm:$0xff]  ;;  %vm44_vm1 = vsmask.f32 256 }
   0x7   :  { %v435_v2 = vld [vmem:[#allocation2 + $0xb8] sm:$0xff]  ;;  %282 = vmatpush.bf16.msra.mxu1 %v427_v1  ;;  %v434_v5 = vld [vmem:[#allocation2 + $0xb0] sm:$0xff]  ;;  %v425_v7 = vld [vmem:[#allocation2 + $0x68] sm:$0xff]  ;;  %v48_v20 = vshrl.u32 %v47_v15, 7 }
   0x8   :  { %295 = vmatpush.bf16.msra.mxu2 %v435_v2  ;;  %v433_v8 = vld [vmem:[#allocation2 + $0xa8] sm:$0xff]  ;;  %v31_v9 = vld [vmem:[%s501_s0] sm:$0xff]  ;;  %v415_v16 = vld [vmem:[#allocation2 + $0x18] sm:$0xff] }
   0x9   :  { %v33_v10 = vunpack.c.h.b16 %v31_v9  ;;  %v416_v11 = vld [vmem:[#allocation2 + $0x20] sm:$0xff]  ;;  %v423_v17 = vld [vmem:[#allocation2 + $0x58] sm:$0xff]  ;;  %v414_v21 = vld [vmem:[#allocation2 + $0x10] sm:$0xff]  ;;  %v56_v26 = vand.u32 3, %v48_v20  ;;  %v69_v31 = vunpack.c.l.b16 %v31_v9 }
   0xa   :  { %270 = vmatpush.bf16.msra.mxu0 %v418_v3  ;;  %v424_v12 = vld [vmem:[#allocation2 + $0x60] sm:$0xff]  ;;  %v431_v18 = vld [vmem:[#allocation2 + $0x98] sm:$0xff]  ;;  %v422_v22 = vld [vmem:[#allocation2 + $0x50] sm:$0xff] }
   0xb   :  { %283 = vmatpush.bf16.msra.mxu1 %v426_v4  ;;  %v432_v13 = vld [vmem:[#allocation2 + $0xa0] sm:$0xff]  ;;  %v34_v14 = vpack.c.b16 %v33_v10, %v33_v10  ;;  %v430_v23 = vld [vmem:[#allocation2 + $0x90] sm:$0xff]  ;;  %v413_v27 = vld [vmem:[#allocation2 + $0x8] sm:$0xff]  ;;  %vm64_vm3 = vcmp.eq.s32.totalorder %v56_v26, 0  ;;  %v70_v36 = vpack.c.b16 %v69_v31, %v69_v31 }
   0xc   :  { %296 = vmatpush.bf16.msra.mxu2 %v434_v5  ;;  %v421_v28 = vld [vmem:[#allocation2 + $0x48] sm:$0xff]  ;;  %vm45_vm2 = vmand %vm43_vm0, %vm44_vm1  ;;  %v412_v32 = vld [vmem:[#allocation2] sm:$0xff] }
   0xd   :  { %v36_v19 = vshrl.u32 %v34_v14, 16  ;;  %v39_v25 = vshll.u32 %v34_v14, 16  ;;  %v429_v29 = vld [vmem:[#allocation2 + $0x88] sm:$0xff]  ;;  %v420_v33 = vld [vmem:[#allocation2 + $0x40] sm:$0xff]  ;;  %vm67_vm4 = vmpackc.low %vm64_vm3, %vm64_vm3 }
   0xe   :  { %271 = vmatpush.bf16.msra.mxu0 %v417_v6  ;;  %v428_v34 = vld [vmem:[#allocation2 + $0x80] sm:$0xff] }
   0xf   :  { %284 = vmatpush.bf16.msra.mxu1 %v425_v7  ;;  %v38_v24 = vrot.slane %v36_v19, 7  ;;  %v439_v38 = vld [vmem:[%s503_s2] ss:$0 sm:$0xff] }
  0x10   :  { %297 = vmatpush.bf16.msra.mxu2 %v433_v8 }
  0x11   :  { %v41_v30 = vor.u32 %v39_v25, %v38_v24 }
  0x12   :  { %272 = vmatpush.bf16.msra.mxu0 %v416_v11 }
  0x13   :  { %285 = vmatpush.bf16.msra.mxu1 %v424_v12  ;;  %v46_v35 = vsel %vm45_vm2, 0, %v41_v30 }
  0x14   :  { %298 = vmatpush.bf16.msra.mxu2 %v432_v13  ;;  %v68_v37 = vsel %vm67_vm4, 0, %v46_v35 }
  0x16   :  { %273 = vmatpush.bf16.msra.mxu0 %v415_v16 }
  0x17   :  { %286 = vmatpush.bf16.msra.mxu1 %v423_v17 }
  0x18   :  { %299 = vmatpush.bf16.msra.mxu2 %v431_v18 }
  0x1a   :  { %274 = vmatpush.bf16.msra.mxu0 %v414_v21 }
  0x1b   :  { %287 = vmatpush.bf16.msra.mxu1 %v422_v22 }
  0x1c   :  { %300 = vmatpush.bf16.msra.mxu2 %v430_v23 }
  0x1e   :  { %275 = vmatpush.bf16.msra.mxu0 %v413_v27 }
  0x1f   :  { %288 = vmatpush.bf16.msra.mxu1 %v421_v28 }
  0x20   :  { %301 = vmatpush.bf16.msra.mxu2 %v429_v29 }
  0x22   :  { %276 = vmatpush.bf16.msra.mxu0 %v412_v32 }
  0x23   :  { %289 = vmatpush.bf16.msra.mxu1 %v420_v33 }
  0x24   :  { %302 = vmatpush.bf16.msra.mxu2 %v428_v34 }
  0x25   :  { %277 = vmatmul.bf16.vlgmr.msra.gmra.mxu0 %v68_v37 }
  0x26   :  { %290 = vmatmul.bf16.vlgmr.msra.gmra.mxu1 %v70_v36 }
  0x27   :  { %303 = vmatmul.bf16.vlgmr.msra.gmra.mxu2 %v34_v14 }
  0xa2   :  { %v278_v39 = vpop.f32.mrf.mxu0 }
  0xa3   :  { %v291_v40 = vpop.f32.mrf.mxu1  ;;  %v279_v41 = vadd.f32 %v439_v38, %v278_v39 }
  0xa5   :  { %v292_v42 = vadd.f32 %v291_v40, %v279_v41 }
  0xaa   :  { %v304_v43 = vpop.f32.mrf.mxu2  ;;  %v280_v45 = vpop.f32.mrf.mxu0 }
  0xab   :  { %v305_v44 = vadd.f32 %v304_v43, %v292_v42  ;;  %v293_v46 = vpop.f32.mrf.mxu1 }
  0xad   :  { %v308_v47 = vmax.f32 %v305_v44, 0.0 }
  0xaf   :  { %v309_v48 = vpack.c.bf16 %v308_v47, %v308_v47 }
  0xb1   :  { %310 = vst [vmem:[%s504_s3] sm:$0xf] %v309_v48 }
  0xb2   :  { %v306_v49 = vpop.f32.mrf.mxu2 }
  0xb3   :  { %315 = vsyncpa [#allocation3], 1 }

// kernel: convnet_forward.11
= control target key start
LH: loop header
LB: loop body
LE: loop exit
PB: predicated region body
PF: predicated region fallthrough
CT: control target
= control target key end

     0   :  { %vm10_vm0 = vcmask 1043456   ;;  %s91_s0 = inlined_call_operand.vmem [shape: f32[2,4,128], index: 0, kind: input, shape index: {}]   ;;  %s92_s1 = inlined_call_operand.vmem [shape: f32[2,4,128], index: 1, kind: output, shape index: {}]  }
   0x1   :  { %v8_v0 = vld [vmem:[%s91_s0] sm:$0xf]  ;;  %v9_v1 = vld [vmem:[%s91_s0 + $0x4] sm:$0xf] }
   0x2   :  { %v11_v2 = vsel %vm10_vm0, %v8_v0, -inf  ;;  %v18_v3 = vsel %vm10_vm0, %v9_v1, -inf }
   0x3   :  { %v12_v4 = vrot.slane %v11_v2, 4  ;;  %v19_v5 = vrot.slane %v18_v3, 4 }
   0x5   :  { %v13_v6 = vmax.f32 %v11_v2, %v12_v4  ;;  %v20_v7 = vmax.f32 %v18_v3, %v19_v5 }
   0x7   :  { %v14_v8 = vrot.slane %v13_v6, 2  ;;  %v21_v9 = vrot.slane %v20_v7, 2 }
   0x9   :  { %v15_v10 = vmax.f32 %v13_v6, %v14_v8  ;;  %v22_v11 = vmax.f32 %v20_v7, %v21_v9 }
   0xb   :  { %v16_v12 = vrot.slane %v15_v10, 1  ;;  %v23_v13 = vrot.slane %v22_v11, 1 }
   0xd   :  { %v17_v14 = vmax.f32 %v15_v10, %v16_v12  ;;  %v24_v15 = vmax.f32 %v22_v11, %v23_v13 }
   0xf   :  { %v25_v16 = vsub.f32 %v8_v0, %v17_v14  ;;  %v26_v17 = vsub.f32 %v9_v1, %v24_v15 }
  0x11   :  { %v27_v18 = vmul.f32 1.442695, %v25_v16  ;;  %v29_v19 = vmul.f32 1.442695, %v26_v17 }
  0x13   :  { %57 = vpow2.f32 %v27_v18 }
  0x14   :  { %59 = vpow2.f32 %v29_v19 }
  0x19   :  { %v58_v20 = vpop.eup %57 }
  0x1a   :  { %v60_v21 = vpop.eup %59  ;;  %v31_v22 = vsel %vm10_vm0, %v58_v20, 0.0 }
  0x1b   :  { %v32_v23 = vrot.slane %v31_v22, 4  ;;  %v38_v24 = vsel %vm10_vm0, %v60_v21, 0.0 }
  0x1c   :  { %v39_v25 = vrot.slane %v38_v24, 4 }
  0x1d   :  { %v33_v26 = vadd.f32 %v32_v23, %v31_v22 }
  0x1e   :  { %v40_v27 = vadd.f32 %v39_v25, %v38_v24 }
  0x1f   :  { %v34_v28 = vrot.slane %v33_v26, 2 }
  0x20   :  { %v41_v29 = vrot.slane %v40_v27, 2 }
  0x21   :  { %v35_v30 = vadd.f32 %v34_v28, %v33_v26 }
  0x22   :  { %v42_v31 = vadd.f32 %v41_v29, %v40_v27 }
  0x23   :  { %v36_v32 = vrot.slane %v35_v30, 1 }
  0x24   :  { %v43_v33 = vrot.slane %v42_v31, 1 }
  0x25   :  { %v37_v34 = vadd.f32 %v36_v32, %v35_v30 }
  0x26   :  { %v44_v35 = vadd.f32 %v43_v33, %v42_v31 }
  0x27   :  { %61 = vlog2.f32 %v37_v34 }
  0x28   :  { %63 = vlog2.f32 %v44_v35 }
  0x2d   :  { %v62_v36 = vpop.eup %61 }
  0x2e   :  { %v64_v37 = vpop.eup %63  ;;  %v46_v38 = vmul.f32 0.6931472, %v62_v36 }
  0x2f   :  { %v48_v39 = vmul.f32 0.6931472, %v64_v37 }
  0x30   :  { %v49_v40 = vsub.f32 %v25_v16, %v46_v38 }
  0x31   :  { %v50_v41 = vsub.f32 %v26_v17, %v48_v39 }
  0x32   :  { %51 = vst [vmem:[%s92_s1] sm:$0xf] %v49_v40 }
  0x33   :  { %52 = vst [vmem:[%s92_s1 + $0x4] sm:$0xf] %v50_v41 }

// kernel: convnet_forward.10
= control target key start
LH: loop header
LB: loop body
LE: loop exit
PB: predicated region body
PF: predicated region fallthrough
CT: control target
= control target key end

     0   :  { %8 = vsyncpa [#allocation3], 0  ;;  %s1680_s0 = inlined_call_operand.vmem [shape: bf16[2,512], index: 0, kind: input, shape index: {}]   ;;  %s1681_s1 = inlined_call_operand.hbm [shape: bf16[512,512], index: 1, kind: input, shape index: {}]   ;;  %s1682_s2 = inlined_call_operand.vmem [shape: f32[1,512], index: 2, kind: input, shape index: {}]   ;;  %s1683_s3 = inlined_call_operand.vmem [shape: f32[2,512], index: 3, kind: output, shape index: {}]  }
   0x1   :  { %10 = vsyncpa [#allocation3 + $0x1], 0  ;;  %s1434_s12 = smov 0   ;;  %s1436_s13 = smov 0  }
   0x2   :  { %s1438_s14 = smov 0   ;;  %s1440_s15 = smov 0  }
   0x3   :  { %s1442_s16 = smov 0   ;;  %s1444_s17 = smov 0  }
   0x4 LB: > { %s933_s18 = sadd.s32 4294967295, %s1408_s17   ;;  %s31_s19 = sadd.s32 1, %s1404_s16  ;;  %s1408_s17 = sphi %s1444_s17, %s16_s17   ;;  %s1404_s16 = sphi %s1442_s16, %s1690_s16   ;;  %s1400_s15 = sphi %s1440_s15, %s1689_s15   ;;  %s1396_s14 = sphi %s1438_s14, %s1688_s14   ;;  %s1392_s13 = sphi %s1436_s13, %s1687_s13   ;;  %s1388_s12 = sphi %s1434_s12, %s1686_s12  }
   0x5   : > { %p33_p0 = scmp.ge.s32.totalorder %s31_s19, 2  ;;  %s72_s20 = sadd.s32 1, %s1396_s14 }
   0x6   : > { %p79_p1 = scmp.ne.s32.totalorder %s1396_s14, %s1392_s13  ;;  %p80_p2 = scmp.eq.s32.totalorder %s1408_s17, 0 }
   0x7   : > { %s1692_s19 = smov (%p33_p0, %s31_s19), 0  ;;  %p85_p4 = scmp.ne.s32.totalorder %s1392_s13, %s1388_s12 }
   0x8   : > { %p1470_p3 = por %p80_p2, %p79_p1  ;;  %s68_s22 = ssub.s32 %s1404_s16, %s1692_s19 }
   0x9   : > { %p86_p5 = scmp.eq.s32.totalorder %s933_s18, 0  ;;  %p70_p6 = scmp.eq.s32.totalorder %s68_s22, 0 }
   0xa   : > { %p1275_p8 = scmp.lt.s32.totalorder %s1408_s17, 2  ;;  %s175_s25 = sand.u32 1, %s1396_s14  }
   0xb   : > { %p1477_p7 = por %p86_p5, %p85_p4  ;;  %s1204_s26 = sshll.u32 %s1404_s16, 3 }
   0xc   : > { %s1483_s24 = scalar_select %p70_p6, %s1396_s14, %s72_s20  }
   0xd   : > { %s938_s27 = sshll.u32 %s175_s25, 9  ;;  %s187_s30 = scalar_lea.hbm %s1681_s1, %s1204_s26 }
   0xe   : > { %s188_s4 = sshll.u32 %s187_s30, 4  ;;  %s179_s5 = scalar_lea.vmem [#allocation2], %s938_s27  ;;  %s189_s4 = int_to_ptr.hbm [resolvable:$true] %s188_s4 }
   0xf   : > { %s190_s6 = sshll.u32 %s179_s5, 4  ;;  %p1272_p9 = pnand %p1275_p8, %p1470_p3  ;;  %s191_s6 = int_to_ptr.vmem [resolvable:$true] %s190_s6 }
  0x10   : > { %p941_p10 = scmp.ge.s32.totalorder %s1408_s17, 1  ;;  %s176_s7 = scalar_lea.sflag [#allocation3], %s175_s25 }
  0x11   : > { %s1410_s8 = smov 256   ;;  %s1411_s9 = smov 128  }
  0x12   : > { %s1412_s10 = smov 8   ;;  %p206_p11 = scmp.lt.s32.totalorder %s1408_s17, 3 }
  0x13   : > { %1274 = dma.hbm_to_vmem [thread:$0]  (!%p1272_p9), %s189_s4, 8192, %s191_s6, %s176_s7, %s1410_s8, %s1411_s9, %s1412_s10  }
  0x14   : > { %p207_p12 = pnand %p941_p10, %p206_p11 }
  0x15   : > { %s212_s11 = sand.u32 (!%p207_p12), 1, %s1392_s13  }
  0x16   : > { %210 = sbr.rel (%p207_p12) target bundleno = 248 (0xf8), region = 32  ;;  %s942_s12 = sshll.u32 (!%p207_p12), %s212_s11, 9 }
  0x17   : > { %s213_s18 = scalar_lea.sflag (!%p207_p12), [#allocation3], %s212_s11  ;;  %s1495_s20 = scalar_lea.vmem (!%p207_p12), [#allocation2], %s942_s12 }
  0x1b   : > { %1383 = dma.done.wait (%p1477_p7), %s213_s18, 8192  }
  0x1c   : > { %1385 = vsyncadd (%p1477_p7), %s213_s18, 4294959104  ;;  %v1004_v0 = vld [vmem:[%s1495_s20 + $0x70] sm:$0xf]  ;;  %v1220_v1 = vld [vmem:[%s1495_s20 + $0x74] sm:$0xf0]  ;;  %s943_s23 = sshll.u32 %s1400_s15, 1 }
  0x1d   : > { %v1068_v2 = vld [vmem:[%s1495_s20 + $0xf0] sm:$0xf]  ;;  %v1005_v3 = vor.u32 %v1220_v1, %v1004_v0  ;;  %v1236_v4 = vld [vmem:[%s1495_s20 + $0xf4] sm:$0xf0]  ;;  %v996_v11 = vld [vmem:[%s1495_s20 + $0x60] sm:$0xf] }
  0x1e   : > { %v1132_v5 = vld [vmem:[%s1495_s20 + $0x170] sm:$0xf]  ;;  %v1252_v6 = vld [vmem:[%s1495_s20 + $0x174] sm:$0xf0]  ;;  %v1069_v7 = vor.u32 %v1236_v4, %v1068_v2  ;;  %v1218_v13 = vld [vmem:[%s1495_s20 + $0x64] sm:$0xf0] }
  0x1f   : > { %v1133_v8 = vor.u32 %v1252_v6, %v1132_v5  ;;  %v1196_v9 = vld [vmem:[%s1495_s20 + $0x1f0] sm:$0xf]  ;;  %v1268_v10 = vld [vmem:[%s1495_s20 + $0x1f4] sm:$0xf0]  ;;  %683 = vmatpush.bf16.msra.mxu0 %v1005_v3  ;;  %v1060_v14 = vld [vmem:[%s1495_s20 + $0xe0] sm:$0xf]  ;;  %v997_v16 = vor.u32 %v1218_v13, %v996_v11 }
  0x20   : > { %v1197_v12 = vor.u32 %v1268_v10, %v1196_v9  ;;  %v1234_v15 = vld [vmem:[%s1495_s20 + $0xe4] sm:$0xf0]  ;;  %696 = vmatpush.bf16.msra.mxu1 %v1069_v7  ;;  %v1124_v18 = vld [vmem:[%s1495_s20 + $0x160] sm:$0xf]  ;;  %v988_v23 = vld [vmem:[%s1495_s20 + $0x50] sm:$0xf] }
  0x21   : > { %709 = vmatpush.bf16.msra.mxu2 %v1133_v8  ;;  %v1061_v17 = vor.u32 %v1234_v15, %v1060_v14  ;;  %v1250_v19 = vld [vmem:[%s1495_s20 + $0x164] sm:$0xf0]  ;;  %v1188_v20 = vld [vmem:[%s1495_s20 + $0x1e0] sm:$0xf]  ;;  %v1216_v24 = vld [vmem:[%s1495_s20 + $0x54] sm:$0xf0] }
  0x22   : > { %722 = vmatpush.bf16.msra.mxu3 %v1197_v12  ;;  %v1125_v21 = vor.u32 %v1250_v19, %v1124_v18  ;;  %v1266_v22 = vld [vmem:[%s1495_s20 + $0x1e4] sm:$0xf0]  ;;  %v1052_v26 = vld [vmem:[%s1495_s20 + $0xd0] sm:$0xf]  ;;  %v1232_v27 = vld [vmem:[%s1495_s20 + $0xd4] sm:$0xf0]  ;;  %v989_v29 = vor.u32 %v1216_v24, %v988_v23 }
  0x23   : > { %v1189_v25 = vor.u32 %v1266_v22, %v1188_v20  ;;  %v1116_v28 = vld [vmem:[%s1495_s20 + $0x150] sm:$0xf]  ;;  %684 = vmatpush.bf16.msra.mxu0 %v997_v16  ;;  %v1248_v30 = vld [vmem:[%s1495_s20 + $0x154] sm:$0xf0]  ;;  %v1053_v33 = vor.u32 %v1232_v27, %v1052_v26  ;;  %v980_v35 = vld [vmem:[%s1495_s20 + $0x40] sm:$0xf] }
  0x24   : > { %v1180_v31 = vld [vmem:[%s1495_s20 + $0x1d0] sm:$0xf]  ;;  %v1264_v32 = vld [vmem:[%s1495_s20 + $0x1d4] sm:$0xf0]  ;;  %697 = vmatpush.bf16.msra.mxu1 %v1061_v17  ;;  %v1117_v34 = vor.u32 %v1248_v30, %v1116_v28  ;;  %v1214_v36 = vld [vmem:[%s1495_s20 + $0x44] sm:$0xf0] }
  0x25   : > { %710 = vmatpush.bf16.msra.mxu2 %v1125_v21  ;;  %v1044_v37 = vld [vmem:[%s1495_s20 + $0xc0] sm:$0xf]  ;;  %v1181_v38 = vor.u32 %v1264_v32, %v1180_v31  ;;  %v1230_v39 = vld [vmem:[%s1495_s20 + $0xc4] sm:$0xf0]  ;;  %v981_v44 = vor.u32 %v1214_v36, %v980_v35  ;;  %v972_v47 = vld [vmem:[%s1495_s20 + $0x30] sm:$0xf] }
  0x26   : > { %723 = vmatpush.bf16.msra.mxu3 %v1189_v25  ;;  %v1108_v40 = vld [vmem:[%s1495_s20 + $0x140] sm:$0xf]  ;;  %v1246_v41 = vld [vmem:[%s1495_s20 + $0x144] sm:$0xf0]  ;;  %v1045_v45 = vor.u32 %v1230_v39, %v1044_v37  ;;  %v1212_v48 = vld [vmem:[%s1495_s20 + $0x34] sm:$0xf0] }
  0x27   : > { %v1172_v42 = vld [vmem:[%s1495_s20 + $0x1c0] sm:$0xf]  ;;  %v1262_v43 = vld [vmem:[%s1495_s20 + $0x1c4] sm:$0xf0]  ;;  %685 = vmatpush.bf16.msra.mxu0 %v989_v29  ;;  %v1109_v46 = vor.u32 %v1246_v41, %v1108_v40  ;;  %v1036_v49 = vld [vmem:[%s1495_s20 + $0xb0] sm:$0xf]  ;;  %v973_v56 = vor.u32 %v1212_v48, %v972_v47 }
  0x28   : > { %698 = vmatpush.bf16.msra.mxu1 %v1053_v33  ;;  %v1173_v50 = vor.u32 %v1262_v43, %v1172_v42  ;;  %v1228_v51 = vld [vmem:[%s1495_s20 + $0xb4] sm:$0xf0]  ;;  %v1100_v52 = vld [vmem:[%s1495_s20 + $0x130] sm:$0xf]  ;;  %v964_v59 = vld [vmem:[%s1495_s20 + $0x20] sm:$0xf] }
  0x29   : > { %711 = vmatpush.bf16.msra.mxu2 %v1117_v34  ;;  %v1244_v53 = vld [vmem:[%s1495_s20 + $0x134] sm:$0xf0]  ;;  %v1164_v54 = vld [vmem:[%s1495_s20 + $0x1b0] sm:$0xf]  ;;  %v1037_v57 = vor.u32 %v1228_v51, %v1036_v49  ;;  %v1210_v60 = vld [vmem:[%s1495_s20 + $0x24] sm:$0xf0] }
  0x2a   : > { %724 = vmatpush.bf16.msra.mxu3 %v1181_v38  ;;  %v1260_v55 = vld [vmem:[%s1495_s20 + $0x1b4] sm:$0xf0]  ;;  %v1101_v58 = vor.u32 %v1244_v53, %v1100_v52  ;;  %v1028_v61 = vld [vmem:[%s1495_s20 + $0xa0] sm:$0xf]  ;;  %v1226_v63 = vld [vmem:[%s1495_s20 + $0xa4] sm:$0xf0]  ;;  %v965_v4 = vor.u32 %v1210_v60, %v964_v59 }
  0x2b   : > { %686 = vmatpush.bf16.msra.mxu0 %v981_v44  ;;  %v1165_v62 = vor.u32 %v1260_v55, %v1164_v54  ;;  %v1092_v0 = vld [vmem:[%s1495_s20 + $0x120] sm:$0xf]  ;;  %v1242_v1 = vld [vmem:[%s1495_s20 + $0x124] sm:$0xf0]  ;;  %v1029_v5 = vor.u32 %v1226_v63, %v1028_v61  ;;  %v956_v7 = vld [vmem:[%s1495_s20 + $0x10] sm:$0xf] }
  0x2c   : > { %699 = vmatpush.bf16.msra.mxu1 %v1045_v45  ;;  %v1156_v2 = vld [vmem:[%s1495_s20 + $0x1a0] sm:$0xf]  ;;  %v1258_v3 = vld [vmem:[%s1495_s20 + $0x1a4] sm:$0xf0]  ;;  %v1093_v6 = vor.u32 %v1242_v1, %v1092_v0  ;;  %v1208_v8 = vld [vmem:[%s1495_s20 + $0x14] sm:$0xf0] }
  0x2d   : > { %712 = vmatpush.bf16.msra.mxu2 %v1109_v46  ;;  %v1020_v9 = vld [vmem:[%s1495_s20 + $0x90] sm:$0xf]  ;;  %v1157_v10 = vor.u32 %v1258_v3, %v1156_v2  ;;  %v1224_v11 = vld [vmem:[%s1495_s20 + $0x94] sm:$0xf0]  ;;  %v948_v16 = vld [vmem:[%s1495_s20] sm:$0xf]  ;;  %v957_v17 = vor.u32 %v1208_v8, %v956_v7 }
  0x2e   : > { %725 = vmatpush.bf16.msra.mxu3 %v1173_v50  ;;  %v1084_v12 = vld [vmem:[%s1495_s20 + $0x110] sm:$0xf]  ;;  %v1240_v13 = vld [vmem:[%s1495_s20 + $0x114] sm:$0xf0]  ;;  %v1206_v18 = vld [vmem:[%s1495_s20 + $0x4] sm:$0xf0]  ;;  %v1021_v21 = vor.u32 %v1224_v11, %v1020_v9 }
  0x2f   : > { %687 = vmatpush.bf16.msra.mxu0 %v973_v56  ;;  %v1148_v14 = vld [vmem:[%s1495_s20 + $0x190] sm:$0xf]  ;;  %v1256_v15 = vld [vmem:[%s1495_s20 + $0x194] sm:$0xf0]  ;;  %v1012_v19 = vld [vmem:[%s1495_s20 + $0x80] sm:$0xf]  ;;  %v1085_v22 = vor.u32 %v1240_v13, %v1084_v12  ;;  %v949_v33 = vor.u32 %v1206_v18, %v948_v16 }
  0x30   : > { %700 = vmatpush.bf16.msra.mxu1 %v1037_v57  ;;  %v1222_v20 = vld [vmem:[%s1495_s20 + $0x84] sm:$0xf0]  ;;  %v1076_v23 = vld [vmem:[%s1495_s20 + $0x100] sm:$0xf]  ;;  %v1149_v26 = vor.u32 %v1256_v15, %v1148_v14  ;;  %v1219_v28 = vld [vmem:[%s1495_s20 + $0x74] sm:$0xf] }
  0x31   : > { %713 = vmatpush.bf16.msra.mxu2 %v1101_v58  ;;  %v1238_v24 = vld [vmem:[%s1495_s20 + $0x104] sm:$0xf0]  ;;  %v1140_v25 = vld [vmem:[%s1495_s20 + $0x180] sm:$0xf]  ;;  %v1006_v29 = vld [vmem:[%s1495_s20 + $0x78] sm:$0xf0]  ;;  %v1013_v36 = vor.u32 %v1222_v20, %v1012_v19 }
  0x32   : > { %726 = vmatpush.bf16.msra.mxu3 %v1165_v62  ;;  %v1254_v27 = vld [vmem:[%s1495_s20 + $0x184] sm:$0xf0]  ;;  %v1235_v30 = vld [vmem:[%s1495_s20 + $0xf4] sm:$0xf]  ;;  %v1070_v31 = vld [vmem:[%s1495_s20 + $0xf8] sm:$0xf0]  ;;  %v1077_v37 = vor.u32 %v1238_v24, %v1076_v23  ;;  %v1009_v41 = vor.u32 %v1219_v28, %v1006_v29 }
  0x33   : > { %688 = vmatpush.bf16.msra.mxu0 %v965_v4  ;;  %v288_v32 = vld [vmem:[%s1680_s0] sm:$0xf]  ;;  %v1251_v34 = vld [vmem:[%s1495_s20 + $0x174] sm:$0xf]  ;;  %v1134_v35 = vld [vmem:[%s1495_s20 + $0x178] sm:$0xf0]  ;;  %v1141_v40 = vor.u32 %v1254_v27, %v1140_v25  ;;  %v1073_v42 = vor.u32 %v1235_v30, %v1070_v31 }
  0x34   : > { %701 = vmatpush.bf16.msra.mxu1 %v1029_v5  ;;  %354 = vst [vmem:[#allocation1] ss:$9 sm:$0xff] %v288_v32  ;;  %v1267_v38 = vld [vmem:[%s1495_s20 + $0x1f4] sm:$0xf]  ;;  %v1198_v39 = vld [vmem:[%s1495_s20 + $0x1f8] sm:$0xf0]  ;;  %v1137_v43 = vor.u32 %v1251_v34, %v1134_v35 }
  0x35   : > { %714 = vmatpush.bf16.msra.mxu2 %v1093_v6  ;;  %v1217_v44 = vld [vmem:[%s1495_s20 + $0x64] sm:$0xf]  ;;  %v998_v45 = vld [vmem:[%s1495_s20 + $0x68] sm:$0xf0]  ;;  %v1201_v47 = vor.u32 %v1267_v38, %v1198_v39  ;;  %v1215_v53 = vld [vmem:[%s1495_s20 + $0x54] sm:$0xf] }
  0x36   : > { %727 = vmatpush.bf16.msra.mxu3 %v1157_v10  ;;  %v1233_v46 = vld [vmem:[%s1495_s20 + $0xe4] sm:$0xf]  ;;  %v1062_v48 = vld [vmem:[%s1495_s20 + $0xe8] sm:$0xf0]  ;;  %v1001_v54 = vor.u32 %v1217_v44, %v998_v45  ;;  %v990_v55 = vld [vmem:[%s1495_s20 + $0x58] sm:$0xf0] }
  0x37   : > { %689 = vmatpush.bf16.msra.mxu0 %v957_v17  ;;  %v1249_v49 = vld [vmem:[%s1495_s20 + $0x164] sm:$0xf]  ;;  %v1126_v50 = vld [vmem:[%s1495_s20 + $0x168] sm:$0xf0]  ;;  %v1231_v56 = vld [vmem:[%s1495_s20 + $0xd4] sm:$0xf]  ;;  %v1065_v58 = vor.u32 %v1233_v46, %v1062_v48  ;;  %v993_v5 = vor.u32 %v1215_v53, %v990_v55 }
  0x38   : > { %702 = vmatpush.bf16.msra.mxu1 %v1021_v21  ;;  %v1265_v51 = vld [vmem:[%s1495_s20 + $0x1e4] sm:$0xf]  ;;  %v1190_v52 = vld [vmem:[%s1495_s20 + $0x1e8] sm:$0xf0]  ;;  %v1054_v57 = vld [vmem:[%s1495_s20 + $0xd8] sm:$0xf0]  ;;  %v1129_v59 = vor.u32 %v1249_v49, %v1126_v50 }
  0x39   : > { %715 = vmatpush.bf16.msra.mxu2 %v1085_v22  ;;  %v1193_v63 = vor.u32 %v1265_v51, %v1190_v52  ;;  %v1247_v0 = vld [vmem:[%s1495_s20 + $0x154] sm:$0xf]  ;;  %v1118_v1 = vld [vmem:[%s1495_s20 + $0x158] sm:$0xf0]  ;;  %v1057_v6 = vor.u32 %v1231_v56, %v1054_v57  ;;  %v1213_v8 = vld [vmem:[%s1495_s20 + $0x44] sm:$0xf] }
  0x3a   : > { %728 = vmatpush.bf16.msra.mxu3 %v1149_v26  ;;  %v1263_v3 = vld [vmem:[%s1495_s20 + $0x1d4] sm:$0xf]  ;;  %v1182_v4 = vld [vmem:[%s1495_s20 + $0x1d8] sm:$0xf0]  ;;  %v1121_v7 = vor.u32 %v1247_v0, %v1118_v1  ;;  %v982_v9 = vld [vmem:[%s1495_s20 + $0x48] sm:$0xf0] }
  0x3b   : > { %690 = vmatpush.bf16.msra.mxu0 %v949_v33  ;;  %v1588_v60 = vld [vmem:[#allocation1 + $0x12] sm:$0xff]  ;;  %v1590_v61 = vld [vmem:[#allocation1 + $0x1b] sm:$0xff]  ;;  %v1597_v2 = vld [vmem:[#allocation1 + $0x9] sm:$0xff]  ;;  %v1185_v11 = vor.u32 %v1263_v3, %v1182_v4  ;;  %v985_v17 = vor.u32 %v1213_v8, %v982_v9  ;;  %p268_p13 = scmp.lt.s32.totalorder %s943_s23, 3  ;;  %vm790_vm0 = vcmask 1041408  }
  0x3c   : > { %703 = vmatpush.bf16.msra.mxu1 %v1013_v36  ;;  %v1592_v62 = vld [vmem:[#allocation1] sm:$0xff]  ;;  %v1229_v10 = vld [vmem:[%s1495_s20 + $0xc4] sm:$0xf]  ;;  %v1046_v12 = vld [vmem:[%s1495_s20 + $0xc8] sm:$0xf0] }
  0x3d   : > { %716 = vmatpush.bf16.msra.mxu2 %v1077_v37  ;;  %v1245_v13 = vld [vmem:[%s1495_s20 + $0x144] sm:$0xf]  ;;  %v1110_v14 = vld [vmem:[%s1495_s20 + $0x148] sm:$0xf0]  ;;  %v1049_v18 = vor.u32 %v1229_v10, %v1046_v12  ;;  %v1211_v20 = vld [vmem:[%s1495_s20 + $0x34] sm:$0xf] }
  0x3e   : > { %729 = vmatpush.bf16.msra.mxu3 %v1141_v40  ;;  %691 = vmatmul.bf16.vlgmr.msra.gmra.mxu0 %v1592_v62  ;;  %v1261_v15 = vld [vmem:[%s1495_s20 + $0x1c4] sm:$0xf]  ;;  %v1174_v16 = vld [vmem:[%s1495_s20 + $0x1c8] sm:$0xf0]  ;;  %v1113_v19 = vor.u32 %v1245_v13, %v1110_v14  ;;  %v974_v21 = vld [vmem:[%s1495_s20 + $0x38] sm:$0xf0] }
  0x3f   : > { %735 = vmatpush.bf16.msrb.mxu0 %v1009_v41  ;;  %704 = vmatmul.bf16.vlgmr.msra.gmra.mxu1 %v1597_v2  ;;  %v1227_v22 = vld [vmem:[%s1495_s20 + $0xb4] sm:$0xf]  ;;  %v1177_v23 = vor.u32 %v1261_v15, %v1174_v16  ;;  %v1038_v24 = vld [vmem:[%s1495_s20 + $0xb8] sm:$0xf0]  ;;  %v977_v29 = vor.u32 %v1211_v20, %v974_v21  ;;  %v1209_v32 = vld [vmem:[%s1495_s20 + $0x24] sm:$0xf] }
  0x40   : > { %748 = vmatpush.bf16.msrb.mxu1 %v1073_v42  ;;  %717 = vmatmul.bf16.vlgmr.msra.gmra.mxu2 %v1588_v60  ;;  %v1243_v25 = vld [vmem:[%s1495_s20 + $0x134] sm:$0xf]  ;;  %v1102_v26 = vld [vmem:[%s1495_s20 + $0x138] sm:$0xf0]  ;;  %v1041_v30 = vor.u32 %v1227_v22, %v1038_v24  ;;  %v966_v33 = vld [vmem:[%s1495_s20 + $0x28] sm:$0xf0] }
  0x41   : > { %761 = vmatpush.bf16.msrb.mxu2 %v1137_v43  ;;  %730 = vmatmul.bf16.vlgmr.msra.gmra.mxu3 %v1590_v61  ;;  %v1259_v27 = vld [vmem:[%s1495_s20 + $0x1b4] sm:$0xf]  ;;  %v1166_v28 = vld [vmem:[%s1495_s20 + $0x1b8] sm:$0xf0]  ;;  %v1105_v31 = vor.u32 %v1243_v25, %v1102_v26  ;;  %v1225_v34 = vld [vmem:[%s1495_s20 + $0xa4] sm:$0xf]  ;;  %v969_v41 = vor.u32 %v1209_v32, %v966_v33 }
  0x42   : > { %774 = vmatpush.bf16.msrb.mxu3 %v1201_v47  ;;  %v1169_v35 = vor.u32 %v1259_v27, %v1166_v28  ;;  %v1030_v36 = vld [vmem:[%s1495_s20 + $0xa8] sm:$0xf0]  ;;  %v1241_v37 = vld [vmem:[%s1495_s20 + $0x124] sm:$0xf]  ;;  %v1207_v44 = vld [vmem:[%s1495_s20 + $0x14] sm:$0xf] }
  0x43   : > { %736 = vmatpush.bf16.msrb.mxu0 %v1001_v54  ;;  %v1094_v38 = vld [vmem:[%s1495_s20 + $0x128] sm:$0xf0]  ;;  %v1257_v39 = vld [vmem:[%s1495_s20 + $0x1a4] sm:$0xf]  ;;  %v1033_v42 = vor.u32 %v1225_v34, %v1030_v36  ;;  %v958_v45 = vld [vmem:[%s1495_s20 + $0x18] sm:$0xf0] }
  0x44   : > { %749 = vmatpush.bf16.msrb.mxu1 %v1065_v58  ;;  %v1158_v40 = vld [vmem:[%s1495_s20 + $0x1a8] sm:$0xf0]  ;;  %v1097_v43 = vor.u32 %v1241_v37, %v1094_v38  ;;  %v1223_v46 = vld [vmem:[%s1495_s20 + $0x94] sm:$0xf]  ;;  %v1022_v48 = vld [vmem:[%s1495_s20 + $0x98] sm:$0xf0]  ;;  %v961_v53 = vor.u32 %v1207_v44, %v958_v45 }
  0x45   : > { %762 = vmatpush.bf16.msrb.mxu2 %v1129_v59  ;;  %v1161_v47 = vor.u32 %v1257_v39, %v1158_v40  ;;  %v1239_v49 = vld [vmem:[%s1495_s20 + $0x114] sm:$0xf]  ;;  %v1086_v50 = vld [vmem:[%s1495_s20 + $0x118] sm:$0xf0]  ;;  %v1025_v54 = vor.u32 %v1223_v46, %v1022_v48  ;;  %v1205_v56 = vld [vmem:[%s1495_s20 + $0x4] sm:$0xf] }
  0x46   : > { %775 = vmatpush.bf16.msrb.mxu3 %v1193_v63  ;;  %v1255_v51 = vld [vmem:[%s1495_s20 + $0x194] sm:$0xf]  ;;  %v1150_v52 = vld [vmem:[%s1495_s20 + $0x198] sm:$0xf0]  ;;  %v1089_v55 = vor.u32 %v1239_v49, %v1086_v50  ;;  %v950_v57 = vld [vmem:[%s1495_s20 + $0x8] sm:$0xf0] }
  0x47   : > { %737 = vmatpush.bf16.msrb.mxu0 %v993_v5  ;;  %v1221_v58 = vld [vmem:[%s1495_s20 + $0x84] sm:$0xf]  ;;  %v1153_v59 = vor.u32 %v1255_v51, %v1150_v52  ;;  %v1014_v63 = vld [vmem:[%s1495_s20 + $0x88] sm:$0xf0]  ;;  %v953_v5 = vor.u32 %v1205_v56, %v950_v57  ;;  %s1694_s23 = smov (!%p268_p13, %s943_s23), 3 }
  0x48   : > { %750 = vmatpush.bf16.msrb.mxu1 %v1057_v6  ;;  %v1237_v0 = vld [vmem:[%s1495_s20 + $0x104] sm:$0xf]  ;;  %v1078_v1 = vld [vmem:[%s1495_s20 + $0x108] sm:$0xf0]  ;;  %v1017_v6 = vor.u32 %v1221_v58, %v1014_v63  ;;  %s945_s25 = sshll.u32 %s1694_s23, 1  ;;  %s270_s30 = scalar_lea.vmem %s1682_s2, %s1694_s23 }
  0x49   : > { %763 = vmatpush.bf16.msrb.mxu2 %v1121_v7  ;;  %v1253_v3 = vld [vmem:[%s1495_s20 + $0x184] sm:$0xf]  ;;  %v1142_v4 = vld [vmem:[%s1495_s20 + $0x188] sm:$0xf0]  ;;  %v1081_v7 = vor.u32 %v1237_v0, %v1078_v1  ;;  %s1652_s28 = scalar_lea.vmem %s1683_s3, %s945_s25  ;;  %v799_v25 = vld [vmem:[%s270_s30] sm:$0x3] }
  0x4a   : > { %776 = vmatpush.bf16.msrb.mxu3 %v1185_v11  ;;  %v1145_v8 = vor.u32 %v1253_v3, %v1142_v4  ;;  %v1413_v11 = vmov 0.0   ;;  %v801_v34 = vperm.slane %v799_v25, 0 }
  0x4b   : > { %738 = vmatpush.bf16.msrb.mxu0 %v985_v17  ;;  %286 = vst [vmem:[%s1652_s28] sm:$0xf] %v1413_v11 }
  0x4c   : > { %751 = vmatpush.bf16.msrb.mxu1 %v1049_v18 }
  0x4d   : > { %764 = vmatpush.bf16.msrb.mxu2 %v1113_v19 }
  0x4e   : > { %777 = vmatpush.bf16.msrb.mxu3 %v1177_v23 }
  0x4f   : > { %739 = vmatpush.bf16.msrb.mxu0 %v977_v29 }
  0x50   : > { %752 = vmatpush.bf16.msrb.mxu1 %v1041_v30  ;;  %v802_v30 = vperm.slane %v799_v25, 1 }
  0x51   : > { %765 = vmatpush.bf16.msrb.mxu2 %v1105_v31 }
  0x52   : > { %778 = vmatpush.bf16.msrb.mxu3 %v1169_v35  ;;  %v287_v27 = vld [vmem:[%s1652_s28] sm:$0xf]  ;;  %v803_v35 = vrot.slane %v802_v30, 6 }
  0x53   : > { %740 = vmatpush.bf16.msrb.mxu0 %v969_v41 }
  0x54   : > { %753 = vmatpush.bf16.msrb.mxu1 %v1033_v42  ;;  %v804_v36 = vsel %vm790_vm0, %v801_v34, %v803_v35 }
  0x55   : > { %766 = vmatpush.bf16.msrb.mxu2 %v1097_v43 }
  0x56   : > { %779 = vmatpush.bf16.msrb.mxu3 %v1161_v47 }
  0x57   : > { %741 = vmatpush.bf16.msrb.mxu0 %v961_v53 }
  0x58   : > { %754 = vmatpush.bf16.msrb.mxu1 %v1025_v54 }
  0x59   : > { %767 = vmatpush.bf16.msrb.mxu2 %v1089_v55 }
  0x5a   : > { %780 = vmatpush.bf16.msrb.mxu3 %v1153_v59 }
  0x5b   : > { %742 = vmatpush.bf16.msrb.mxu0 %v953_v5 }
  0x5c   : > { %755 = vmatpush.bf16.msrb.mxu1 %v1017_v6 }
  0x5d   : > { %768 = vmatpush.bf16.msrb.mxu2 %v1081_v7 }
  0x5e   : > { %781 = vmatpush.bf16.msrb.mxu3 %v1145_v8  ;;  %743 = vmatmul.bf16.vlgmr.msrb.gmra.mxu0 %v1592_v62 }
  0x5f   : > { %756 = vmatmul.bf16.vlgmr.msrb.gmra.mxu1 %v1597_v2 }
  0x60   : > { %769 = vmatmul.bf16.vlgmr.msrb.gmra.mxu2 %v1588_v60 }
  0x61   : > { %782 = vmatmul.bf16.vlgmr.msrb.gmra.mxu3 %v1590_v61 }
  0xbb   : > { %v692_v9 = vpop.f32.mrf.mxu0 }
  0xbc   : > { %v705_v10 = vpop.f32.mrf.mxu1 }
  0xbd   : > { %v706_v16 = vadd.f32 %v705_v10, %v692_v9 }
  0xc3   : > { %v718_v62 = vpop.f32.mrf.mxu2  ;;  %v694_v12 = vpop.f32.mrf.mxu0 }
  0xc4   : > { %v731_v2 = vpop.f32.mrf.mxu3  ;;  %v707_v60 = vpop.f32.mrf.mxu1  ;;  %v719_v19 = vadd.f32 %v718_v62, %v706_v16 }
  0xc6   : > { %v732_v26 = vadd.f32 %v731_v2, %v719_v19 }
  0xcb   : > { %v720_v13 = vpop.f32.mrf.mxu2 }
  0xcc   : > { %v733_v61 = vpop.f32.mrf.mxu3 }
  0xdb   : > { %v744_v14 = vpop.f32.mrf.mxu0 }
  0xdc   : > { %v757_v15 = vpop.f32.mrf.mxu1 }
  0xdd   : > { %v758_v17 = vadd.f32 %v757_v15, %v744_v14 }
  0xe3   : > { %v770_v18 = vpop.f32.mrf.mxu2  ;;  %v746_v22 = vpop.f32.mrf.mxu0 }
  0xe4   : > { %v771_v20 = vadd.f32 %v770_v18, %v758_v17  ;;  %v783_v21 = vpop.f32.mrf.mxu3  ;;  %v759_v23 = vpop.f32.mrf.mxu1 }
  0xe6   : > { %v784_v24 = vadd.f32 %v783_v21, %v771_v20 }
  0xe8   : > { %v789_v28 = vrot.slane %v784_v24, 6 }
  0xea   : > { %v791_v29 = vsel %vm790_vm0, %v732_v26, %v789_v28 }
  0xeb   : > { %v793_v31 = vadd.f32 %v791_v29, %v287_v27  ;;  %v772_v32 = vpop.f32.mrf.mxu2 }
  0xec   : > { %v785_v33 = vpop.f32.mrf.mxu3 }
  0xed   : > { %794 = vst [vmem:[%s1652_s28] sm:$0xf] %v793_v31 }
  0xf4   : > { %v798_v37 = vld [vmem:[%s1652_s28] sm:$0xf] }
  0xf5   : > { %v806_v38 = vadd.f32 %v804_v36, %v798_v37 }
  0xf7   : > { %807 = vst [vmem:[%s1652_s28] sm:$0xf] %v806_v38 }
  0xf8 PF: > { %s16_s17 = sadd.s32 1, %s1408_s17   ;;  %s1686_s12 = smov %s1392_s13 }
  0xf9   : > { %p13_p0 = scmp.ge.s32.totalorder %s16_s17, 4   ;;  %s1687_s13 = smov %s1396_s14 }
  0xfa   : > { %s1688_s14 = smov %s1483_s24  ;;  %s1689_s15 = smov %s1404_s16 }
  0xfb   : > { %s1690_s16 = smov %s1692_s19  ;;  %15 = sbr.rel (!%p13_p0) target bundleno = 4 (0x4), region = 86 }
 0x100   :  { %838 = vsyncpa [#allocation3], 1 }
 0x101   :  { %840 = vsyncpa [#allocation3 + $0x1], 1 }

</bundles_post_ra>
